<compile_context>
chip_gen: v5e
topology: v5e:2x2
jax: 0.10.0
libtpu: 0.0.40
codegen_flags: <defaults>
</compile_context>

<pallas_src>
import functools
import math

import jax
import jax.numpy as jnp
from jax.experimental import pallas as pl
from jax.experimental.pallas import tpu as pltpu

BN_EPS = 1e-5      # torch.nn.BatchNorm1d default eps
LANE = 128         # TPU lane width; hidden feature dim is zero-padded to this
HEAD_ALIGN = 8     # fused-head output lanes padded to a multiple of this (narrow writeback)


def _bayesian_regressor_kernel(
    x_ref,
    w1_ref, w2_ref,
    wh_ref, bh_ref,
    g1_ref, beta1_ref,
    g2_ref, beta2_ref,
    m1_ref, m2_ref,
    out_ref,
    *, nb_tile, batch, inv_keep,
):
    """One grid step = nb_tile independent batches, flattened to nb_tile*batch rows."""
    inv_b = 1.0 / batch

    def bn_relu_drop(h, g_ref, beta_ref, m_ref):
        # Train-mode BatchNorm1d with *per-original-batch* statistics: reduce over
        # axis=1 of the (nb_tile, batch, H) view — flattening the batches would
        # change model semantics.  Fused single sweep: var = E[h^2] - mean^2
        # (one fewer XLU reduction pass), clamped at 0 against fp cancellation.
        h3 = h.reshape(nb_tile, batch, h.shape[-1])
        mean = jnp.sum(h3, axis=1, keepdims=True) * inv_b          # (T, 1, H)
        ex2 = jnp.sum(h3 * h3, axis=1, keepdims=True) * inv_b      # (T, 1, H)
        var = jnp.maximum(ex2 - mean * mean, 0.0)
        # Padded lanes hit rsqrt(0 + eps) ~ 316, but gamma is zero-padded there,
        # so they stay exactly 0 — do not remove the gamma zero-padding.
        gr = g_ref[...] * jax.lax.rsqrt(var + BN_EPS)               # EUP rsqrt
        # Fold the inverted-dropout 1/(1-p) scale into the BN affine: since
        # inv_keep > 0, relu(a)*inv_keep*m == relu(a*inv_keep)*m.
        scale = gr * inv_keep
        shift = (beta_ref[...] - mean * gr) * inv_keep
        h3 = jnp.maximum(h3 * scale + shift, 0.0)
        # int8 keep-bit mask (0/1): 4x less HBM traffic than prescaled f32 masks.
        return h3.reshape(h.shape) * m_ref[...].astype(jnp.float32)

    # ---- bfc1 (bias omitted: exactly cancelled by BatchNorm mean subtraction) ----
    # bf16 MXU path with f32 accumulation.
    h = jnp.dot(x_ref[...].astype(jnp.bfloat16), w1_ref[...],
                preferred_element_type=jnp.float32)                 # (R, H_pad) f32
    h = bn_relu_drop(h, g1_ref, beta1_ref, m1_ref)

    # ---- bfc2 (bias again cancelled by batchnorm2) ----
    h = jnp.dot(h.astype(jnp.bfloat16), w2_ref[...],
                preferred_element_type=jnp.float32)
    h = bn_relu_drop(h, g2_ref, beta2_ref, m2_ref)

    # ---- fused heads: [bfc3 | bfc_logvar | zero-pad] in one narrow (8-lane) matmul ----
    out_ref[...] = (jnp.dot(h.astype(jnp.bfloat16), wh_ref[...],
                            preferred_element_type=jnp.float32) + bh_ref[...])


def _pick_nb_tile(n_batches, batch, h_pad):
    """Batches fused per grid step."""
    # VMEM budget for live f32 activations (~6 buffers of (nb_tile*batch, h_pad) f32);
    # conservative so the same choice fits v7x's 64 MiB as well as v5e/v6e's 128 MiB.
    per_batch_bytes = batch * h_pad * 4 * 6
    nb = max(1, min(256, (8 << 20) // per_batch_bytes))
    # Keep >= 2 grid steps when possible so v7x's second TensorCore gets work.
    nb = min(nb, max(1, pl.cdiv(n_batches, 2)))
    # Round tile rows up to a multiple of 32 so the int8 dropout-mask blocks stay
    # aligned to the packed (32, 128) int8 memory tiling.
    g = 32 // math.gcd(32, batch)
    return pl.cdiv(nb, g) * g


def bayesian_regressor_forward(x, params, mask1, mask2, out_size, dropout_rate,
                               nb_tile=None):
    """
    x:            (n_batches, batch, in_size) or (batch, in_size) float32
    mask1, mask2: matching (..., LANE) int8 dropout keep-bits (0/1)
    Returns (y_hat, log_var), each (..., out_size).  BatchNorm statistics are
    computed per original batch, matching one PyTorch forward() per batch.
    """
    squeeze = x.ndim == 2
    if squeeze:
        x, mask1, mask2 = x[None], mask1[None], mask2[None]
    assert 0.0 <= dropout_rate < 1.0
    inv_keep = 1.0 / (1.0 - dropout_rate)

    n_batches, batch, in_size = x.shape
    h_pad = params["w1"].shape[1]
    head_pad = params["w_head"].shape[1]

    if nb_tile is None:
        nb_tile = _pick_nb_tile(n_batches, batch, h_pad)
    n_steps = pl.cdiv(n_batches, nb_tile)
    nbp = n_steps * nb_tile
    if nbp != n_batches:
        # Zero-pad to a whole number of tiles; padded batches stay finite
        # (h=0, var=0 -> rsqrt(eps) scaled by gamma on zeros) and are sliced off below.
        pad = ((0, nbp - n_batches), (0, 0), (0, 0))
        x = jnp.pad(x, pad)
        mask1 = jnp.pad(mask1, pad)
        mask2 = jnp.pad(mask2, pad)

    rows, tile_rows = nbp * batch, nb_tile * batch
    x2 = x.reshape(rows, in_size)
    m1 = mask1.reshape(rows, h_pad)
    m2 = mask2.reshape(rows, h_pad)

    kernel = functools.partial(_bayesian_regressor_kernel,
                               nb_tile=nb_tile, batch=batch, inv_keep=inv_keep)

    def resident(shape):                      # weights / BN params: VMEM-resident
        return pl.BlockSpec(shape, lambda i: (0, 0))

    def row_block(feat):                      # nb_tile batches (as rows) per grid step
        return pl.BlockSpec((tile_rows, feat), lambda i: (i, 0))

    fused = pl.pallas_call(
        kernel,
        out_shape=jax.ShapeDtypeStruct((rows, head_pad), jnp.float32),
        grid=(n_steps,),
        in_specs=[
            row_block(in_size),                 # x
            resident((in_size, h_pad)),         # w1 (bf16)
            resident((h_pad, h_pad)),           # w2 (bf16)
            resident((h_pad, head_pad)),        # w_head = [w3 | w_logvar | 0] (bf16)
            resident((1, head_pad)),            # b_head
            resident((1, h_pad)),               # gamma1
            resident((1, h_pad)),               # beta1
            resident((1, h_pad)),               # gamma2
            resident((1, h_pad)),               # beta2
            row_block(h_pad),                   # mask1 (int8 keep bits)
            row_block(h_pad),                   # mask2 (int8 keep bits)
        ],
        out_specs=row_block(head_pad),
        compiler_params=pltpu.CompilerParams(
            # Batches are independent across grid steps -> safe to shard over v7x's
            # two TensorCores.
            # TODO(synk): if an xprof profile shows one v7x TC idle, switch this axis
            # to pltpu.CORE_PARALLEL (or pl.core_map over create_tensorcore_mesh).
            dimension_semantics=("parallel",),
            vmem_limit_bytes=32 * 1024 * 1024,
        ),
    )(
        x2,
        params["w1"], params["w2"],
        params["w_head"], params["b_head"],
        params["gamma1"], params["beta1"],
        params["gamma2"], params["beta2"],
        m1, m2,
    )

    fused = fused.reshape(nbp, batch, head_pad)[:n_batches]
    y_hat = fused[..., :out_size]
    log_var = fused[..., out_size:2 * out_size]
    if squeeze:
        y_hat, log_var = y_hat[0], log_var[0]
    return y_hat, log_var


# ---------------- parameter setup (plain-JAX glue, one-time) ----------------

def _sample_bayesian_linear(key, in_f, out_f):
    """SGVB reparameterization: W = mu + softplus(rho) * eps (same for bias)."""
    k_mu, k_eps_w, k_eps_b = jax.random.split(key, 3)
    w_mu = 0.1 * jax.random.normal(k_mu, (in_f, out_f), dtype=jnp.float32)
    b_mu = jnp.zeros((1, out_f), dtype=jnp.float32)
    w_sigma = jax.nn.softplus(jnp.full((in_f, out_f), -3.0, dtype=jnp.float32))
    b_sigma = jax.nn.softplus(jnp.full((1, out_f), -3.0, dtype=jnp.float32))
    w = w_mu + w_sigma * jax.random.normal(k_eps_w, (in_f, out_f), dtype=jnp.float32)
    b = b_mu + b_sigma * jax.random.normal(k_eps_b, (1, out_f), dtype=jnp.float32)
    return w, b


def init_params(key, in_size, hidden_size, out_size, lane=LANE):
    assert hidden_size <= lane
    head_pad = max(HEAD_ALIGN, ((2 * out_size + HEAD_ALIGN - 1) // HEAD_ALIGN) * HEAD_ALIGN)

    k1, k2, k3, k4 = jax.random.split(key, 4)
    w1, _b1 = _sample_bayesian_linear(k1, in_size, hidden_size)       # b1 cancelled by BN1
    w2, _b2 = _sample_bayesian_linear(k2, hidden_size, hidden_size)   # b2 cancelled by BN2
    w3, b3 = _sample_bayesian_linear(k3, hidden_size, out_size)
    wlv, blv = _sample_bayesian_linear(k4, hidden_size, out_size)

    # zero-pad hidden dim to the 128-lane granule, head dim to a narrow 8-lane slab;
    # matmul weights stored bf16 (MXU fast path), BN params / head bias stay f32.
    w1_p = (jnp.zeros((in_size, lane), jnp.float32)
            .at[:, :hidden_size].set(w1)).astype(jnp.bfloat16)
    w2_p = (jnp.zeros((lane, lane), jnp.float32)
            .at[:hidden_size, :hidden_size].set(w2)).astype(jnp.bfloat16)
    w_head = (jnp.zeros((lane, head_pad), jnp.float32)
              .at[:hidden_size, :out_size].set(w3)
              .at[:hidden_size, out_size:2 * out_size].set(wlv)).astype(jnp.bfloat16)
    b_head = (jnp.zeros((1, head_pad), jnp.float32)
              .at[:, :out_size].set(b3)
              .at[:, out_size:2 * out_size].set(blv))

    # gamma zero-padded beyond hidden_size: keeps padded lanes exactly 0 after BN.
    gamma = jnp.zeros((1, lane), jnp.float32).at[:, :hidden_size].set(1.0)
    beta = jnp.zeros((1, lane), jnp.float32)
    return {
        "w1": w1_p, "w2": w2_p,
        "w_head": w_head, "b_head": b_head,
        "gamma1": gamma, "beta1": beta,
        "gamma2": gamma, "beta2": beta,
    }


def make_dropout_masks(key, n_batches, batch, hidden_size, dropout_rate, lane=LANE):
    """Dropout keep-bits as int8 (0/1), lane-padded to 128.  The 1/(1-p) inverted-
    dropout scale is applied inside the kernel (folded into the BN affine)."""
    assert 0.0 <= dropout_rate < 1.0, "dropout_rate must be in [0, 1)"
    keep_p = 1.0 - dropout_rate
    k1, k2 = jax.random.split(key)
    shape = (n_batches, batch, hidden_size)
    m1 = jax.random.bernoulli(k1, keep_p, shape)
    m2 = jax.random.bernoulli(k2, keep_p, shape)
    pad = ((0, 0), (0, 0), (0, lane - hidden_size))
    return (jnp.pad(m1, pad).astype(jnp.int8),
            jnp.pad(m2, pad).astype(jnp.int8))


# ---------------- pure-JAX reference (for correctness check) ----------------
# Mirrors the kernel's numerics choices (bf16 matmul operands with f32 accumulation,
# f32 BN statistics, folded dropout scale) so it checks the Pallas pipeline exactly.

def _reference_forward(x, params, mask1, mask2, out_size, dropout_rate):
    inv_keep = 1.0 / (1.0 - dropout_rate)

    def bn(h, g, b):
        m = jnp.mean(h, axis=0, keepdims=True)
        v = jnp.mean((h - m) ** 2, axis=0, keepdims=True)
        return g * (h - m) * jax.lax.rsqrt(v + BN_EPS) + b

    def one(xb, m1, m2):
        h = jnp.dot(xb.astype(jnp.bfloat16), params["w1"],
                    preferred_element_type=jnp.float32)
        h = jnp.maximum(bn(h, params["gamma1"], params["beta1"]), 0.0)
        h = h * (m1.astype(jnp.float32) * inv_keep)
        h = jnp.dot(h.astype(jnp.bfloat16), params["w2"],
                    preferred_element_type=jnp.float32)
        h = jnp.maximum(bn(h, params["gamma2"], params["beta2"]), 0.0)
        h = h * (m2.astype(jnp.float32) * inv_keep)
        return (jnp.dot(h.astype(jnp.bfloat16), params["w_head"],
                        preferred_element_type=jnp.float32) + params["b_head"])

    o = jax.vmap(one)(x, mask1, mask2)
    return o[..., :out_size], o[..., out_size:2 * out_size]


if __name__ == "__main__":
    in_size, hidden_size, out_size = 16, 32, 1
    n_batches, batch, dropout_rate = 10, 8, 0.1

    key = jax.random.PRNGKey(0)
    k_x, k_params, k_drop = jax.random.split(key, 3)

    x = jax.random.normal(k_x, (n_batches, batch, in_size), dtype=jnp.float32)
    params = init_params(k_params, in_size, hidden_size, out_size)
    mask1, mask2 = make_dropout_masks(k_drop, n_batches, batch, hidden_size, dropout_rate)

    y_hat, log_var = bayesian_regressor_forward(
        x, params, mask1, mask2, out_size, dropout_rate)
    jax.block_until_ready((y_hat, log_var))

    assert y_hat.shape == (n_batches, batch, out_size)
    assert log_var.shape == (n_batches, batch, out_size)
    assert bool(jnp.all(jnp.isfinite(y_hat))) and bool(jnp.all(jnp.isfinite(log_var)))

    y_ref, lv_ref = _reference_forward(x, params, mask1, mask2, out_size, dropout_rate)
    assert bool(jnp.allclose(y_hat, y_ref, rtol=1e-2, atol=1e-2))
    assert bool(jnp.allclose(log_var, lv_ref, rtol=1e-2, atol=1e-2))

    # TODO(synk): KL accumulation (self.kl_loss) is a training-time side effect, not part of forward compute.
    print("KERNEL_OK")
</pallas_src>

<mosaic_0001>
module attributes {stable_mosaic.version = 11 : i64} {
  func.func @_bayesian_regressor_kernel(%arg0: i32, %arg1: memref<64x16xf32, #tpu.memory_space<vmem>>, %arg2: memref<16x128xbf16, #tpu.memory_space<vmem>>, %arg3: memref<128x128xbf16, #tpu.memory_space<vmem>>, %arg4: memref<128x8xbf16, #tpu.memory_space<vmem>>, %arg5: memref<1x8xf32, #tpu.memory_space<vmem>>, %arg6: memref<1x128xf32, #tpu.memory_space<vmem>>, %arg7: memref<1x128xf32, #tpu.memory_space<vmem>>, %arg8: memref<1x128xf32, #tpu.memory_space<vmem>>, %arg9: memref<1x128xf32, #tpu.memory_space<vmem>>, %arg10: memref<64x128xi8, #tpu.memory_space<vmem>>, %arg11: memref<64x128xi8, #tpu.memory_space<vmem>>, %arg12: memref<64x8xf32, #tpu.memory_space<vmem>>) attributes {dimension_semantics = [#tpu.dimension_semantics<parallel>], iteration_bounds = array<i64: 2>, scalar_prefetch = 0 : i64, scratch_operands = 0 : i64, tpu.core_type = #tpu.core_type<tc>, window_params = [{transform_indices = @transform_0, window_bounds = array<i64: 64, 16>}, {pipeline_mode = #tpu.pipeline_mode<synchronous>, transform_indices = @transform_1, window_bounds = array<i64: 16, 128>}, {pipeline_mode = #tpu.pipeline_mode<synchronous>, transform_indices = @transform_2, window_bounds = array<i64: 128, 128>}, {pipeline_mode = #tpu.pipeline_mode<synchronous>, transform_indices = @transform_3, window_bounds = array<i64: 128, 8>}, {pipeline_mode = #tpu.pipeline_mode<synchronous>, transform_indices = @transform_4, window_bounds = array<i64: 1, 8>}, {pipeline_mode = #tpu.pipeline_mode<synchronous>, transform_indices = @transform_5, window_bounds = array<i64: 1, 128>}, {pipeline_mode = #tpu.pipeline_mode<synchronous>, transform_indices = @transform_6, window_bounds = array<i64: 1, 128>}, {pipeline_mode = #tpu.pipeline_mode<synchronous>, transform_indices = @transform_7, window_bounds = array<i64: 1, 128>}, {pipeline_mode = #tpu.pipeline_mode<synchronous>, transform_indices = @transform_8, window_bounds = array<i64: 1, 128>}, {transform_indices = @transform_9, window_bounds = array<i64: 64, 128>}, {transform_indices = @transform_10, window_bounds = array<i64: 64, 128>}, {transform_indices = @transform_11, window_bounds = array<i64: 64, 8>}]} {
    %c0 = arith.constant 0 : index
    %c0_0 = arith.constant 0 : index
    %0 = vector.load %arg1[%c0, %c0_0] : memref<64x16xf32, #tpu.memory_space<vmem>>, vector<64x16xf32>
    %1 = arith.truncf %0 : vector<64x16xf32> to vector<64x16xbf16>
    %c0_1 = arith.constant 0 : index
    %c0_2 = arith.constant 0 : index
    %2 = vector.load %arg2[%c0_1, %c0_2] : memref<16x128xbf16, #tpu.memory_space<vmem>>, vector<16x128xbf16>
    %cst = arith.constant dense<0.000000e+00> : vector<64x128xf32>
    %3 = tpu.matmul %1, %2, %cst {dimension_numbers = #tpu.dot_dimension_numbers<[1], [0], [0], [1], [0, 0, 1, 1], [], []>} : vector<64x16xbf16>, vector<16x128xbf16>, vector<64x128xf32> -> vector<64x128xf32>
    %4 = vector.shape_cast %3 : vector<64x128xf32> to vector<8x8x128xf32>
    %cst_3 = arith.constant dense<0.000000e+00> : vector<8x128xf32>
    %5 = vector.multi_reduction <add>, %4, %cst_3 [1] : vector<8x8x128xf32> to vector<8x128xf32>
    %6 = vector.shape_cast %5 : vector<8x128xf32> to vector<8x1x128xf32>
    %cst_4 = arith.constant 1.250000e-01 : f32
    %7 = vector.broadcast %cst_4 : f32 to vector<8x1x128xf32>
    %8 = arith.mulf %6, %7 : vector<8x1x128xf32>
    %9 = arith.mulf %4, %4 : vector<8x8x128xf32>
    %cst_5 = arith.constant dense<0.000000e+00> : vector<8x128xf32>
    %10 = vector.multi_reduction <add>, %9, %cst_5 [1] : vector<8x8x128xf32> to vector<8x128xf32>
    %11 = vector.shape_cast %10 : vector<8x128xf32> to vector<8x1x128xf32>
    %cst_6 = arith.constant 1.250000e-01 : f32
    %12 = vector.broadcast %cst_6 : f32 to vector<8x1x128xf32>
    %13 = arith.mulf %11, %12 : vector<8x1x128xf32>
    %14 = arith.mulf %8, %8 : vector<8x1x128xf32>
    %15 = arith.subf %13, %14 : vector<8x1x128xf32>
    %cst_7 = arith.constant 0.000000e+00 : f32
    %16 = vector.broadcast %cst_7 : f32 to vector<8x1x128xf32>
    %17 = arith.maximumf %15, %16 : vector<8x1x128xf32>
    %c0_8 = arith.constant 0 : index
    %c0_9 = arith.constant 0 : index
    %18 = vector.load %arg6[%c0_8, %c0_9] : memref<1x128xf32, #tpu.memory_space<vmem>>, vector<1x128xf32>
    %cst_10 = arith.constant 9.99999974E-6 : f32
    %19 = vector.broadcast %cst_10 : f32 to vector<8x1x128xf32>
    %20 = arith.addf %17, %19 : vector<8x1x128xf32>
    %21 = math.rsqrt %20 : vector<8x1x128xf32>
    %22 = vector.shape_cast %18 : vector<1x128xf32> to vector<1x1x128xf32>
    %23 = vector.broadcast %22 : vector<1x1x128xf32> to vector<8x1x128xf32>
    %24 = arith.mulf %23, %21 : vector<8x1x128xf32>
    %cst_11 = arith.constant 1.11111116 : f32
    %25 = vector.broadcast %cst_11 : f32 to vector<8x1x128xf32>
    %26 = arith.mulf %24, %25 : vector<8x1x128xf32>
    %c0_12 = arith.constant 0 : index
    %c0_13 = arith.constant 0 : index
    %27 = vector.load %arg7[%c0_12, %c0_13] : memref<1x128xf32, #tpu.memory_space<vmem>>, vector<1x128xf32>
    %28 = arith.mulf %8, %24 : vector<8x1x128xf32>
    %29 = vector.shape_cast %27 : vector<1x128xf32> to vector<1x1x128xf32>
    %30 = vector.broadcast %29 : vector<1x1x128xf32> to vector<8x1x128xf32>
    %31 = arith.subf %30, %28 : vector<8x1x128xf32>
    %cst_14 = arith.constant 1.11111116 : f32
    %32 = vector.broadcast %cst_14 : f32 to vector<8x1x128xf32>
    %33 = arith.mulf %31, %32 : vector<8x1x128xf32>
    %34 = vector.broadcast %26 : vector<8x1x128xf32> to vector<8x8x128xf32>
    %35 = arith.mulf %4, %34 : vector<8x8x128xf32>
    %36 = vector.broadcast %33 : vector<8x1x128xf32> to vector<8x8x128xf32>
    %37 = arith.addf %35, %36 : vector<8x8x128xf32>
    %cst_15 = arith.constant 0.000000e+00 : f32
    %38 = vector.broadcast %cst_15 : f32 to vector<8x8x128xf32>
    %39 = arith.maximumf %37, %38 : vector<8x8x128xf32>
    %40 = vector.shape_cast %39 : vector<8x8x128xf32> to vector<64x128xf32>
    %c0_16 = arith.constant 0 : index
    %c0_17 = arith.constant 0 : index
    %41 = vector.load %arg10[%c0_16, %c0_17] : memref<64x128xi8, #tpu.memory_space<vmem>>, vector<64x128xi8>
    %42 = arith.sitofp %41 : vector<64x128xi8> to vector<64x128xf32>
    %43 = arith.mulf %40, %42 : vector<64x128xf32>
    %44 = arith.truncf %43 : vector<64x128xf32> to vector<64x128xbf16>
    %c0_18 = arith.constant 0 : index
    %c0_19 = arith.constant 0 : index
    %45 = vector.load %arg3[%c0_18, %c0_19] : memref<128x128xbf16, #tpu.memory_space<vmem>>, vector<128x128xbf16>
    %cst_20 = arith.constant dense<0.000000e+00> : vector<64x128xf32>
    %46 = tpu.matmul %44, %45, %cst_20 {dimension_numbers = #tpu.dot_dimension_numbers<[1], [0], [0], [1], [0, 0, 1, 1], [], []>} : vector<64x128xbf16>, vector<128x128xbf16>, vector<64x128xf32> -> vector<64x128xf32>
    %47 = vector.shape_cast %46 : vector<64x128xf32> to vector<8x8x128xf32>
    %cst_21 = arith.constant dense<0.000000e+00> : vector<8x128xf32>
    %48 = vector.multi_reduction <add>, %47, %cst_21 [1] : vector<8x8x128xf32> to vector<8x128xf32>
    %49 = vector.shape_cast %48 : vector<8x128xf32> to vector<8x1x128xf32>
    %cst_22 = arith.constant 1.250000e-01 : f32
    %50 = vector.broadcast %cst_22 : f32 to vector<8x1x128xf32>
    %51 = arith.mulf %49, %50 : vector<8x1x128xf32>
    %52 = arith.mulf %47, %47 : vector<8x8x128xf32>
    %cst_23 = arith.constant dense<0.000000e+00> : vector<8x128xf32>
    %53 = vector.multi_reduction <add>, %52, %cst_23 [1] : vector<8x8x128xf32> to vector<8x128xf32>
    %54 = vector.shape_cast %53 : vector<8x128xf32> to vector<8x1x128xf32>
    %cst_24 = arith.constant 1.250000e-01 : f32
    %55 = vector.broadcast %cst_24 : f32 to vector<8x1x128xf32>
    %56 = arith.mulf %54, %55 : vector<8x1x128xf32>
    %57 = arith.mulf %51, %51 : vector<8x1x128xf32>
    %58 = arith.subf %56, %57 : vector<8x1x128xf32>
    %cst_25 = arith.constant 0.000000e+00 : f32
    %59 = vector.broadcast %cst_25 : f32 to vector<8x1x128xf32>
    %60 = arith.maximumf %58, %59 : vector<8x1x128xf32>
    %c0_26 = arith.constant 0 : index
    %c0_27 = arith.constant 0 : index
    %61 = vector.load %arg8[%c0_26, %c0_27] : memref<1x128xf32, #tpu.memory_space<vmem>>, vector<1x128xf32>
    %cst_28 = arith.constant 9.99999974E-6 : f32
    %62 = vector.broadcast %cst_28 : f32 to vector<8x1x128xf32>
    %63 = arith.addf %60, %62 : vector<8x1x128xf32>
    %64 = math.rsqrt %63 : vector<8x1x128xf32>
    %65 = vector.shape_cast %61 : vector<1x128xf32> to vector<1x1x128xf32>
    %66 = vector.broadcast %65 : vector<1x1x128xf32> to vector<8x1x128xf32>
    %67 = arith.mulf %66, %64 : vector<8x1x128xf32>
    %cst_29 = arith.constant 1.11111116 : f32
    %68 = vector.broadcast %cst_29 : f32 to vector<8x1x128xf32>
    %69 = arith.mulf %67, %68 : vector<8x1x128xf32>
    %c0_30 = arith.constant 0 : index
    %c0_31 = arith.constant 0 : index
    %70 = vector.load %arg9[%c0_30, %c0_31] : memref<1x128xf32, #tpu.memory_space<vmem>>, vector<1x128xf32>
    %71 = arith.mulf %51, %67 : vector<8x1x128xf32>
    %72 = vector.shape_cast %70 : vector<1x128xf32> to vector<1x1x128xf32>
    %73 = vector.broadcast %72 : vector<1x1x128xf32> to vector<8x1x128xf32>
    %74 = arith.subf %73, %71 : vector<8x1x128xf32>
    %cst_32 = arith.constant 1.11111116 : f32
    %75 = vector.broadcast %cst_32 : f32 to vector<8x1x128xf32>
    %76 = arith.mulf %74, %75 : vector<8x1x128xf32>
    %77 = vector.broadcast %69 : vector<8x1x128xf32> to vector<8x8x128xf32>
    %78 = arith.mulf %47, %77 : vector<8x8x128xf32>
    %79 = vector.broadcast %76 : vector<8x1x128xf32> to vector<8x8x128xf32>
    %80 = arith.addf %78, %79 : vector<8x8x128xf32>
    %cst_33 = arith.constant 0.000000e+00 : f32
    %81 = vector.broadcast %cst_33 : f32 to vector<8x8x128xf32>
    %82 = arith.maximumf %80, %81 : vector<8x8x128xf32>
    %83 = vector.shape_cast %82 : vector<8x8x128xf32> to vector<64x128xf32>
    %c0_34 = arith.constant 0 : index
    %c0_35 = arith.constant 0 : index
    %84 = vector.load %arg11[%c0_34, %c0_35] : memref<64x128xi8, #tpu.memory_space<vmem>>, vector<64x128xi8>
    %85 = arith.sitofp %84 : vector<64x128xi8> to vector<64x128xf32>
    %86 = arith.mulf %83, %85 : vector<64x128xf32>
    %87 = arith.truncf %86 : vector<64x128xf32> to vector<64x128xbf16>
    %c0_36 = arith.constant 0 : index
    %c0_37 = arith.constant 0 : index
    %88 = vector.load %arg4[%c0_36, %c0_37] : memref<128x8xbf16, #tpu.memory_space<vmem>>, vector<128x8xbf16>
    %cst_38 = arith.constant dense<0.000000e+00> : vector<64x8xf32>
    %89 = tpu.matmul %87, %88, %cst_38 {dimension_numbers = #tpu.dot_dimension_numbers<[1], [0], [0], [1], [0, 0, 1, 1], [], []>} : vector<64x128xbf16>, vector<128x8xbf16>, vector<64x8xf32> -> vector<64x8xf32>
    %c0_39 = arith.constant 0 : index
    %c0_40 = arith.constant 0 : index
    %90 = vector.load %arg5[%c0_39, %c0_40] : memref<1x8xf32, #tpu.memory_space<vmem>>, vector<1x8xf32>
    %91 = vector.broadcast %90 : vector<1x8xf32> to vector<64x8xf32>
    %92 = arith.addf %89, %91 : vector<64x8xf32>
    %c0_41 = arith.constant 0 : index
    %c0_42 = arith.constant 0 : index
    %93 = vector.load %arg12[%c0_41, %c0_42] : memref<64x8xf32, #tpu.memory_space<vmem>>, vector<64x8xf32>
    tpu.vector_store %arg12[%c0_41, %c0_42], %92 {strides = array<i32>} : memref<64x8xf32, #tpu.memory_space<vmem>>, vector<64x8xf32>,
    return
  }
  func.func @transform_0(%arg0: i32) -> (i32, i32) {
    %c0_i32 = arith.constant 0 : i32
    %c0_i32_0 = arith.constant 0 : i32
    return %arg0, %c0_i32 : i32, i32
  }
  func.func @transform_1(%arg0: i32) -> (i32, i32) {
    %c0_i32 = arith.constant 0 : i32
    %c0_i32_0 = arith.constant 0 : i32
    %c0_i32_1 = arith.constant 0 : i32
    return %c0_i32, %c0_i32_0 : i32, i32
  }
  func.func @transform_2(%arg0: i32) -> (i32, i32) {
    %c0_i32 = arith.constant 0 : i32
    %c0_i32_0 = arith.constant 0 : i32
    %c0_i32_1 = arith.constant 0 : i32
    return %c0_i32, %c0_i32_0 : i32, i32
  }
  func.func @transform_3(%arg0: i32) -> (i32, i32) {
    %c0_i32 = arith.constant 0 : i32
    %c0_i32_0 = arith.constant 0 : i32
    %c0_i32_1 = arith.constant 0 : i32
    return %c0_i32, %c0_i32_0 : i32, i32
  }
  func.func @transform_4(%arg0: i32) -> (i32, i32) {
    %c0_i32 = arith.constant 0 : i32
    %c0_i32_0 = arith.constant 0 : i32
    %c0_i32_1 = arith.constant 0 : i32
    return %c0_i32, %c0_i32_0 : i32, i32
  }
  func.func @transform_5(%arg0: i32) -> (i32, i32) {
    %c0_i32 = arith.constant 0 : i32
    %c0_i32_0 = arith.constant 0 : i32
    %c0_i32_1 = arith.constant 0 : i32
    return %c0_i32, %c0_i32_0 : i32, i32
  }
  func.func @transform_6(%arg0: i32) -> (i32, i32) {
    %c0_i32 = arith.constant 0 : i32
    %c0_i32_0 = arith.constant 0 : i32
    %c0_i32_1 = arith.constant 0 : i32
    return %c0_i32, %c0_i32_0 : i32, i32
  }
  func.func @transform_7(%arg0: i32) -> (i32, i32) {
    %c0_i32 = arith.constant 0 : i32
    %c0_i32_0 = arith.constant 0 : i32
    %c0_i32_1 = arith.constant 0 : i32
    return %c0_i32, %c0_i32_0 : i32, i32
  }
  func.func @transform_8(%arg0: i32) -> (i32, i32) {
    %c0_i32 = arith.constant 0 : i32
    %c0_i32_0 = arith.constant 0 : i32
    %c0_i32_1 = arith.constant 0 : i32
    return %c0_i32, %c0_i32_0 : i32, i32
  }
  func.func @transform_9(%arg0: i32) -> (i32, i32) {
    %c0_i32 = arith.constant 0 : i32
    %c0_i32_0 = arith.constant 0 : i32
    return %arg0, %c0_i32 : i32, i32
  }
  func.func @transform_10(%arg0: i32) -> (i32, i32) {
    %c0_i32 = arith.constant 0 : i32
    %c0_i32_0 = arith.constant 0 : i32
    return %arg0, %c0_i32 : i32, i32
  }
  func.func @transform_11(%arg0: i32) -> (i32, i32) {
    %c0_i32 = arith.constant 0 : i32
    %c0_i32_0 = arith.constant 0 : i32
    return %arg0, %c0_i32 : i32, i32
  }
}

</mosaic_0001>

<bundles_post_ra>
// kernel: tpu_custom_call.1
= control target key start
LH: loop header
LB: loop body
LE: loop exit
PB: predicated region body
PF: predicated region fallthrough
CT: control target
= control target key end

     0   :  { %s1757_s17 = smov 0   ;;  %s2265_s0 = inlined_call_operand.vmem [shape: f32[128,16], index: 0, kind: input, shape index: {}]   ;;  %s2266_s1 = inlined_call_operand.vmem [shape: bf16[16,128], index: 1, kind: input, shape index: {}]   ;;  %s2267_s2 = inlined_call_operand.vmem [shape: bf16[128,128], index: 2, kind: input, shape index: {}]   ;;  %s2268_s3 = inlined_call_operand.vmem [shape: bf16[128,8], index: 3, kind: input, shape index: {}]   ;;  %s2269_s4 = inlined_call_operand.vmem [shape: f32[1,8], index: 4, kind: input, shape index: {}]   ;;  %s2270_s5 = inlined_call_operand.vmem [shape: f32[1,128], index: 5, kind: input, shape index: {}]   ;;  %s2271_s6 = inlined_call_operand.vmem [shape: f32[1,128], index: 6, kind: input, shape index: {}]   ;;  %s2272_s7 = inlined_call_operand.vmem [shape: f32[1,128], index: 7, kind: input, shape index: {}]   ;;  %s2273_s8 = inlined_call_operand.vmem [shape: f32[1,128], index: 8, kind: input, shape index: {}]   ;;  %s2274_s9 = inlined_call_operand.vmem [shape: s8[128,128], index: 9, kind: input, shape index: {}]   ;;  %s2275_s10 = inlined_call_operand.vmem [shape: s8[128,128], index: 10, kind: input, shape index: {}]   ;;  %s2276_s11 = inlined_call_operand.vmem [shape: f32[128,8], index: 11, kind: output, shape index: {}]  }
   0x1 LB: > { %s1528_s18 = sadd.s32 4294967295, %s1695_s17   ;;  %p1532_p0 = scmp.ge.s32.totalorder %s1695_s17, 1  ;;  %s1695_s17 = sphi %s1757_s17, %s21_s17  }
   0x2   : > { %p360_p1 = scmp.lt.s32.totalorder %s1695_s17, 3 }
   0x4   : > { %p361_p2 = pnand %p1532_p0, %p360_p1 }
   0x5   : > { %s1533_s21 = sshll.u32 (!%p361_p2), %s1528_s18, 3  ;;  %s1535_s19 = sshll.u32 (!%p361_p2), %s1528_s18, 1 }
   0x6   : > { %364 = sbr.rel (%p361_p2) target bundleno = 610 (0x262), region = 64  ;;  %p411_p3 = scmp.lt.s32.totalorder (!%p361_p2), %s1533_s21, 15 }
   0x7   : > { %p417_p4 = scmp.lt.s32.totalorder (!%p361_p2), %s1535_s19, 3 }
   0xb   : > { %v1615_v0 = vld [vmem:[%s2266_s1] sm:$0xff]  ;;  %s2286_s21 = smov (!%p411_p3, %s1533_s21), 15  ;;  %vm455_vm0 = vcmask 130048   ;;  %v1623_v18 = vld [vmem:[%s2267_s2 + $0x38] sm:$0xff]  ;;  %v1622_v24 = vld [vmem:[%s2267_s2 + $0x30] sm:$0xff]  ;;  %s2288_s19 = smov (!%p417_p4, %s1535_s19), 3 }
   0xc   : > { %475 = vmatpush.bf16.msra.mxu0 %v1615_v0  ;;  %s1534_s22 = sshll.u32 %s2286_s21, 3  ;;  %937 = vmatpush.bf16.msra.mxu1 %v1623_v18  ;;  %v1621_v33 = vld [vmem:[%s2267_s2 + $0x28] sm:$0xff]  ;;  %v1620_v52 = vld [vmem:[%s2267_s2 + $0x20] sm:$0xff]  ;;  %v1619_v61 = vld [vmem:[%s2267_s2 + $0x18] sm:$0xff]  ;;  %s1536_s27 = sshll.u32 %s2288_s19, 3 }
   0xd   : > { %s414_s25 = scalar_lea.vmem %s2265_s0, %s1534_s22  ;;  %1632 = vmatpush.bf16.msra.mxu3 %v1623_v18  ;;  %s1882_s30 = scalar_lea.vmem %s2274_s9, %s1536_s27 }
   0xe   : > { %v435_v1 = vld [vmem:[%s414_s25] sm:$0xff]  ;;  %v436_v2 = vld [vmem:[%s414_s25 + $0x8] sm:$0xff]  ;;  %v437_v4 = vld [vmem:[%s414_s25 + $0x10] sm:$0xff]  ;;  %s2098_s16 = scalar_lea.vmem %s2275_s10, %s1536_s27  ;;  %s432_s13 = scalar_lea.vmem %s2276_s11, %s1534_s22 }
   0xf   : > { %v443_v3 = vpack.c.bf16 %v436_v2, %v435_v1  ;;  %v438_v5 = vld [vmem:[%s414_s25 + $0x18] sm:$0xff]  ;;  %v439_v7 = vld [vmem:[%s414_s25 + $0x20] sm:$0xff]  ;;  %v440_v8 = vld [vmem:[%s414_s25 + $0x28] sm:$0xff] }
  0x10   : > { %v444_v6 = vpack.c.bf16 %v438_v5, %v437_v4  ;;  %v445_v9 = vpack.c.bf16 %v440_v8, %v439_v7  ;;  %v441_v10 = vld [vmem:[%s414_s25 + $0x30] sm:$0xff]  ;;  %v442_v11 = vld [vmem:[%s414_s25 + $0x38] sm:$0xff]  ;;  %938 = vmatpush.bf16.msra.mxu1 %v1622_v24 }
  0x11   : > { %1545 = vmatmul.msk.bf16.vlgmr.msra.gmra.mxu0 %vm455_vm0, %v443_v3  ;;  %v446_v12 = vpack.c.bf16 %v442_v11, %v441_v10  ;;  %1633 = vmatpush.bf16.msra.mxu3 %v1622_v24  ;;  %v1618_v11 = vld [vmem:[%s2267_s2 + $0x10] sm:$0xff] }
  0x14   : > { %939 = vmatpush.bf16.msra.mxu1 %v1621_v33 }
  0x15   : > { %1634 = vmatpush.bf16.msra.mxu3 %v1621_v33 }
  0x18   : > { %940 = vmatpush.bf16.msra.mxu1 %v1620_v52 }
  0x19   : > { %1635 = vmatpush.bf16.msra.mxu3 %v1620_v52 }
  0x1c   : > { %941 = vmatpush.bf16.msra.mxu1 %v1619_v61 }
  0x1d   : > { %1636 = vmatpush.bf16.msra.mxu3 %v1619_v61 }
  0x20   : > { %942 = vmatpush.bf16.msra.mxu1 %v1618_v11 }
  0x21   : > { %1546 = vmatmul.msk.bf16.gmra.mxu0 %vm455_vm0, %v444_v6  ;;  %1637 = vmatpush.bf16.msra.mxu3 %v1618_v11 }
  0x31   : > { %1547 = vmatmul.msk.bf16.gmra.mxu0 %vm455_vm0, %v445_v9 }
  0x41   : > { %1548 = vmatmul.msk.bf16.gmra.mxu0 %vm455_vm0, %v446_v12 }
  0x8e   : > { %v1778_v13 = vpop.f32.mrf.mxu0 }
  0x8f   : > { %v497_v14 = vrot.slane %v1778_v13, 4  ;;  %v553_v15 = vmul.f32 %v1778_v13, %v1778_v13 }
  0x91   : > { %v498_v16 = vadd.f32 %v497_v14, %v1778_v13  ;;  %v561_v17 = vrot.slane %v553_v15, 4 }
  0x93   : > { %v499_v19 = vrot.slane %v498_v16, 2  ;;  %v562_v20 = vadd.f32 %v561_v17, %v553_v15 }
  0x95   : > { %v500_v21 = vadd.f32 %v499_v19, %v498_v16  ;;  %v563_v22 = vrot.slane %v562_v20, 2 }
  0x96   : > { %v1787_v23 = vpop.f32.mrf.mxu0 }
  0x97   : > { %v501_v25 = vrot.slane %v500_v21, 1  ;;  %v564_v26 = vadd.f32 %v563_v22, %v562_v20  ;;  %v503_v27 = vrot.slane %v1787_v23, 4  ;;  %v554_v28 = vmul.f32 %v1787_v23, %v1787_v23 }
  0x99   : > { %v502_v29 = vadd.f32 %v501_v25, %v500_v21  ;;  %v565_v30 = vrot.slane %v564_v26, 1  ;;  %v504_v31 = vadd.f32 %v503_v27, %v1787_v23  ;;  %v567_v32 = vrot.slane %v554_v28, 4  ;;  %v1617_v27 = vld [vmem:[%s2267_s2 + $0x8] sm:$0xff] }
  0x9a   : > { %943 = vmatpush.bf16.msra.mxu1 %v1617_v27  ;;  %1638 = vmatpush.bf16.msra.mxu3 %v1617_v27 }
  0x9b   : > { %v1799_v34 = vmul.f32 0.125, %v502_v29  ;;  %v566_v35 = vadd.f32 %v565_v30, %v564_v26  ;;  %v505_v36 = vrot.slane %v504_v31, 2  ;;  %v568_v37 = vadd.f32 %v567_v32, %v554_v28 }
  0x9d   : > { %v609_v38 = vmul.f32 0.125, %v566_v35  ;;  %v617_v39 = vmul.f32 %v1799_v34, %v1799_v34  ;;  %v506_v40 = vadd.f32 %v505_v36, %v504_v31  ;;  %v569_v41 = vrot.slane %v568_v37, 2 }
  0x9e   : > { %v1803_v42 = vpop.f32.mrf.mxu0 }
  0x9f   : > { %v625_v43 = vsub.f32 %v609_v38, %v617_v39  ;;  %v507_v44 = vrot.slane %v506_v40, 1  ;;  %v570_v45 = vadd.f32 %v569_v41, %v568_v37  ;;  %v509_v46 = vrot.slane %v1803_v42, 4  ;;  %v1616_v41 = vld [vmem:[%s2267_s2] sm:$0xff] }
  0xa0   : > { %v555_v47 = vmul.f32 %v1803_v42, %v1803_v42  ;;  %944 = vmatpush.bf16.msra.mxu1 %v1616_v41  ;;  %1639 = vmatpush.bf16.msra.mxu3 %v1616_v41 }
  0xa1   : > { %v633_v48 = vmax.f32 %v625_v43, 0.0  ;;  %v508_v49 = vadd.f32 %v507_v44, %v506_v40  ;;  %v571_v50 = vrot.slane %v570_v45, 1  ;;  %v510_v51 = vadd.f32 %v509_v46, %v1803_v42 }
  0xa2   : > { %v573_v53 = vrot.slane %v555_v47, 4 }
  0xa3   : > { %v1812_v54 = vadd.f32 1e-05, %v633_v48  ;;  %v1814_v55 = vmul.f32 0.125, %v508_v49  ;;  %v572_v56 = vadd.f32 %v571_v50, %v570_v45  ;;  %v511_v57 = vrot.slane %v510_v51, 2 }
  0xa4   : > { %v574_v58 = vadd.f32 %v573_v53, %v555_v47 }
  0xa5   : > { %1657 = vrsqrt.f32 %v1812_v54  ;;  %v610_v59 = vmul.f32 0.125, %v572_v56  ;;  %v618_v60 = vmul.f32 %v1814_v55, %v1814_v55  ;;  %v512_v62 = vadd.f32 %v511_v57, %v510_v51 }
  0xa6   : > { %v575_v63 = vrot.slane %v574_v58, 2  ;;  %v1822_v0 = vpop.f32.mrf.mxu0  ;;  %vm656_vm2 = vweird.f32 %v1812_v54 }
  0xa7   : > { %v626_v1 = vsub.f32 %v610_v59, %v618_v60  ;;  %v515_v2 = vrot.slane %v1822_v0, 4  ;;  %v556_v3 = vmul.f32 %v1822_v0, %v1822_v0  ;;  %v513_v4 = vrot.slane %v512_v62, 1 }
  0xa8   : > { %v576_v5 = vadd.f32 %v575_v63, %v574_v58 }
  0xa9   : > { %v634_v6 = vmax.f32 %v626_v1, 0.0  ;;  %v516_v7 = vadd.f32 %v515_v2, %v1822_v0  ;;  %v579_v8 = vrot.slane %v556_v3, 4  ;;  %v514_v9 = vadd.f32 %v513_v4, %v512_v62  ;;  %v1899_v4 = vld [vmem:[%s1882_s30] sm:$0xff] }
  0xaa   : > { %v577_v10 = vrot.slane %v576_v5, 1 }
  0xab   : > { %v1833_v12 = vpop.eup %1657  ;;  %v1835_v14 = vadd.f32 1e-05, %v634_v6  ;;  %v517_v15 = vrot.slane %v516_v7, 2  ;;  %v580_v16 = vadd.f32 %v579_v8, %v556_v3  ;;  %v1839_v18 = vmul.f32 0.125, %v514_v9 }
  0xac   : > { %v651_v17 = vmul.f32 %v1833_v12, %v1812_v54  ;;  %v578_v19 = vadd.f32 %v577_v10, %v576_v5  ;;  %vm657_vm1 = vweird.f32 %v1833_v12  ;;  %v1887_v54 = vld [vmem:[%s2270_s5] sm:$0x1] }
  0xad   : > { %1659 = vrsqrt.f32 %v1835_v14  ;;  %v518_v20 = vadd.f32 %v517_v15, %v516_v7  ;;  %v581_v21 = vrot.slane %v580_v16, 2  ;;  %v619_v25 = vmul.f32 %v1839_v18, %v1839_v18  ;;  %vm1871_vm3 = vmor %vm656_vm2, %vm657_vm1 }
  0xae   : > { %v652_v22 = vmul.f32 %v1833_v12, %v651_v17  ;;  %v611_v24 = vmul.f32 0.125, %v578_v19  ;;  %v1845_v26 = vpop.f32.mrf.mxu0  ;;  %v845_v17 = vunpack.c.0.s8 %v1899_v4  ;;  %vm666_vm5 = vweird.f32 %v1835_v14 }
  0xaf   : > { %v519_v28 = vrot.slane %v518_v20, 1  ;;  %v582_v29 = vadd.f32 %v581_v21, %v580_v16  ;;  %v521_v30 = vrot.slane %v1845_v26, 4  ;;  %v557_v31 = vmul.f32 %v1845_v26, %v1845_v26 }
  0xb0   : > { %v653_v32 = vmul.f32 0.5, %v652_v22  ;;  %v627_v33 = vsub.f32 %v611_v24, %v619_v25 }
  0xb1   : > { %v520_v35 = vadd.f32 %v519_v28, %v518_v20  ;;  %v583_v36 = vrot.slane %v582_v29, 1  ;;  %v522_v37 = vadd.f32 %v521_v30, %v1845_v26  ;;  %v585_v38 = vrot.slane %v557_v31, 4 }
  0xb2   : > { %v654_v39 = vsub.f32 1.5, %v653_v32  ;;  %v635_v40 = vmax.f32 %v627_v33, 0.0 }
  0xb3   : > { %v1660_v43 = vpop.eup %1659  ;;  %v1862_v44 = vmul.f32 0.125, %v520_v35  ;;  %v584_v45 = vadd.f32 %v583_v36, %v582_v29  ;;  %v523_v46 = vrot.slane %v522_v37, 2  ;;  %v586_v47 = vadd.f32 %v585_v38, %v557_v31  ;;  %v1926_v35 = vld [vmem:[%s2271_s6] sm:$0x1] }
  0xb4   : > { %v655_v48 = vmul.f32 %v1833_v12, %v654_v39  ;;  %v661_v49 = vmul.f32 %v1660_v43, %v1835_v14  ;;  %v1867_v50 = vadd.f32 1e-05, %v635_v40  ;;  %vm667_vm4 = vweird.f32 %v1660_v43 }
  0xb5   : > { %v612_v52 = vmul.f32 0.125, %v584_v45  ;;  %v620_v53 = vmul.f32 %v1862_v44, %v1862_v44  ;;  %v524_v56 = vadd.f32 %v523_v46, %v522_v37  ;;  %v587_v57 = vrot.slane %v586_v47, 2  ;;  %vm668_vm6 = vmor %vm666_vm5, %vm667_vm4 }
  0xb6   : > { %v659_v58 = vsel %vm1871_vm3, %v1833_v12, %v655_v48  ;;  %v662_v59 = vmul.f32 %v1660_v43, %v661_v49  ;;  %1661 = vrsqrt.f32 %v1867_v50  ;;  %v1893_v60 = vpop.f32.mrf.mxu0  ;;  %vm676_vm7 = vweird.f32 %v1867_v50 }
  0xb7   : > { %v628_v61 = vsub.f32 %v612_v52, %v620_v53  ;;  %v525_v62 = vrot.slane %v524_v56, 1  ;;  %v588_v63 = vadd.f32 %v587_v57, %v586_v47  ;;  %v527_v2 = vrot.slane %v1893_v60, 4 }
  0xb8   : > { %v663_v1 = vmul.f32 0.5, %v662_v59  ;;  %v558_v3 = vmul.f32 %v1893_v60, %v1893_v60  ;;  %v730_v5 = vmul.f32 %v659_v58, %v1887_v54  ;;  %v1928_v36 = vcvt.s32.f32 %v845_v17 }
  0xb9   : > { %v636_v6 = vmax.f32 %v628_v61, 0.0  ;;  %v526_v7 = vadd.f32 %v525_v62, %v524_v56  ;;  %v589_v8 = vrot.slane %v588_v63, 1  ;;  %v528_v10 = vadd.f32 %v527_v2, %v1893_v60 }
  0xba   : > { %v664_v9 = vsub.f32 1.5, %v663_v1  ;;  %v591_v11 = vrot.slane %v558_v3, 4  ;;  %v1911_v24 = vmul.f32 1.1111112, %v730_v5  ;;  %v747_v14 = vmul.f32 %v730_v5, %v1799_v34 }
  0xbb   : > { %v1903_v12 = vadd.f32 1e-05, %v636_v6  ;;  %v1905_v15 = vmul.f32 0.125, %v526_v7  ;;  %v590_v16 = vadd.f32 %v589_v8, %v588_v63  ;;  %v529_v21 = vrot.slane %v528_v10, 2 }
  0xbc   : > { %v1908_v19 = vpop.eup %1661  ;;  %v665_v20 = vmul.f32 %v1660_v43, %v664_v9  ;;  %v592_v22 = vadd.f32 %v591_v11, %v558_v3  ;;  %v779_v34 = vperm.slane %v1911_v24, 0  ;;  %v755_v48 = vsub.f32 %v1926_v35, %v747_v14 }
  0xbd   : > { %v671_v25 = vmul.f32 %v1908_v19, %v1867_v50  ;;  %1663 = vrsqrt.f32 %v1903_v12  ;;  %v613_v28 = vmul.f32 0.125, %v590_v16  ;;  %v621_v29 = vmul.f32 %v1905_v15, %v1905_v15 }
  0xbe   : > { %v669_v27 = vsel %vm668_vm6, %v1660_v43, %v665_v20  ;;  %v1919_v30 = vpop.f32.mrf.mxu0  ;;  %v530_v32 = vadd.f32 %v529_v21, %v528_v10  ;;  %v593_v33 = vrot.slane %v592_v22, 2  ;;  %vm677_vm8 = vweird.f32 %v1908_v19 }
  0xbf   : > { %v672_v31 = vmul.f32 %v1908_v19, %v671_v25  ;;  %v731_v37 = vmul.f32 %v669_v27, %v1887_v54  ;;  %v629_v38 = vsub.f32 %v613_v28, %v621_v29  ;;  %v533_v39 = vrot.slane %v1919_v30, 4  ;;  %vm1952_vm9 = vmor %vm676_vm7, %vm677_vm8 }
  0xc0   : > { %v559_v40 = vmul.f32 %v1919_v30, %v1919_v30  ;;  %v531_v43 = vrot.slane %v530_v32, 1  ;;  %v594_v45 = vadd.f32 %v593_v33, %v592_v22  ;;  %vm686_vm10 = vweird.f32 %v1903_v12 }
  0xc1   : > { %v673_v41 = vmul.f32 0.5, %v672_v31  ;;  %v637_v46 = vmax.f32 %v629_v38, 0.0  ;;  %v534_v47 = vadd.f32 %v533_v39, %v1919_v30  ;;  %v739_v57 = vmul.f32 1.1111112, %v731_v37 }
  0xc2   : > { %v532_v52 = vadd.f32 %v531_v43, %v530_v32  ;;  %v595_v53 = vrot.slane %v594_v45, 1  ;;  %v597_v56 = vrot.slane %v559_v40, 4  ;;  %v748_v2 = vmul.f32 %v731_v37, %v1814_v55 }
  0xc3   : > { %v1938_v49 = vpop.eup %1663  ;;  %v674_v51 = vsub.f32 1.5, %v673_v41  ;;  %v1942_v59 = vadd.f32 1e-05, %v637_v46  ;;  %v535_v61 = vrot.slane %v534_v47, 2  ;;  %v780_v10 = vperm.slane %v739_v57, 0 }
  0xc4   : > { %v681_v58 = vmul.f32 %v1938_v49, %v1903_v12  ;;  %v1945_v63 = vmul.f32 0.125, %v532_v52  ;;  %v596_v1 = vadd.f32 %v595_v53, %v594_v45  ;;  %v598_v9 = vadd.f32 %v597_v56, %v559_v40 }
  0xc5   : > { %v675_v62 = vmul.f32 %v1908_v19, %v674_v51  ;;  %1665 = vrsqrt.f32 %v1942_v59  ;;  %v536_v6 = vadd.f32 %v535_v61, %v534_v47  ;;  %v756_v24 = vsub.f32 %v1926_v35, %v748_v2 }
  0xc6   : > { %v682_v5 = vmul.f32 %v1938_v49, %v681_v58  ;;  %v1959_v7 = vpop.f32.mrf.mxu0  ;;  %v614_v8 = vmul.f32 0.125, %v596_v1  ;;  %v622_v50 = vmul.f32 %v1945_v63, %v1945_v63  ;;  %v599_v21 = vrot.slane %v598_v9, 2 }
  0xc7   : > { %v679_v55 = vsel %vm1952_vm9, %v1908_v19, %v675_v62  ;;  %v537_v16 = vrot.slane %v536_v6, 1  ;;  %v539_v17 = vrot.slane %v1959_v7, 4  ;;  %v560_v22 = vmul.f32 %v1959_v7, %v1959_v7 }
  0xc8   : > { %v683_v11 = vmul.f32 0.5, %v682_v5  ;;  %v630_v20 = vsub.f32 %v614_v8, %v622_v50  ;;  %v732_v25 = vmul.f32 %v679_v55, %v1887_v54  ;;  %vm687_vm11 = vweird.f32 %v1938_v49 }
  0xc9   : > { %v538_v27 = vadd.f32 %v537_v16, %v536_v6  ;;  %v540_v28 = vadd.f32 %v539_v17, %v1959_v7  ;;  %v600_v14 = vadd.f32 %v599_v21, %v598_v9  ;;  %v763_v31 = vmul.f32 1.1111112, %v755_v48  ;;  %vm1985_vm12 = vmor %vm686_vm10, %vm687_vm11 }
  0xca   : > { %v684_v19 = vsub.f32 1.5, %v683_v11  ;;  %v638_v29 = vmax.f32 %v630_v20, 0.0  ;;  %v603_v39 = vrot.slane %v560_v22, 4  ;;  %v764_v45 = vmul.f32 1.1111112, %v756_v24 }
  0xcb   : > { %v1666_v32 = vpop.eup %1665  ;;  %v1974_v37 = vmul.f32 0.125, %v538_v27  ;;  %v541_v38 = vrot.slane %v540_v28, 2  ;;  %v601_v43 = vrot.slane %v600_v14, 1  ;;  %v795_v46 = vmul.f32 %v779_v34, %v1778_v13 }
  0xcc   : > { %v685_v33 = vmul.f32 %v1938_v49, %v684_v19  ;;  %v691_v40 = vmul.f32 %v1666_v32, %v1942_v59  ;;  %v1977_v41 = vadd.f32 1e-05, %v638_v29  ;;  %v796_v47 = vmul.f32 %v780_v10, %v1787_v23 }
  0xcd   : > { %v740_v51 = vmul.f32 1.1111112, %v732_v25  ;;  %v542_v52 = vadd.f32 %v541_v38, %v540_v28  ;;  %v623_v13 = vmul.f32 %v1974_v37, %v1974_v37  ;;  %v602_v23 = vadd.f32 %v601_v43, %v600_v14 }
  0xce   : > { %v689_v53 = vsel %vm1985_vm12, %v1938_v49, %v685_v33  ;;  %v692_v56 = vmul.f32 %v1666_v32, %v691_v40  ;;  %1667 = vrsqrt.f32 %v1977_v41  ;;  %v604_v57 = vadd.f32 %v603_v39, %v560_v22 }
  0xcf   : > { %v543_v34 = vrot.slane %v542_v52, 1  ;;  %v811_v58 = vperm.slane %v763_v31, 0  ;;  %vm697_vm13 = vweird.f32 %v1666_v32  ;;  %v812_v61 = vperm.slane %v764_v45, 0 }
  0xd0   : > { %v693_v12 = vmul.f32 0.5, %v692_v56  ;;  %v846_v62 = vunpack.c.1.s8 %v1899_v4  ;;  %v615_v1 = vmul.f32 0.125, %v602_v23  ;;  %v605_v3 = vrot.slane %v604_v57, 2 }
  0xd1   : > { %v544_v2 = vadd.f32 %v543_v34, %v542_v52  ;;  %v827_v5 = vadd.f32 %v811_v58, %v795_v46  ;;  %v733_v49 = vmul.f32 %v689_v53, %v1887_v54  ;;  %v828_v55 = vadd.f32 %v812_v61, %v796_v47 }
  0xd2   : > { %v694_v6 = vsub.f32 1.5, %v693_v12  ;;  %v854_v8 = vcvt.s32.f32 %v846_v62  ;;  %vm696_vm14 = vweird.f32 %v1942_v59  ;;  %v631_v50 = vsub.f32 %v615_v1, %v623_v13 }
  0xd3   : > { %v606_v9 = vadd.f32 %v605_v3, %v604_v57  ;;  %v835_v10 = vmax.f32 %v827_v5, 0.0  ;;  %v1998_v17 = vmul.f32 0.125, %v544_v2  ;;  %v836_v20 = vmax.f32 %v828_v55, 0.0  ;;  %vm698_vm15 = vmor %vm696_vm14, %vm697_vm13 }
  0xd4   : > { %v1668_v11 = vpop.eup %1667  ;;  %v695_v16 = vmul.f32 %v1666_v32, %v694_v6  ;;  %v749_v21 = vmul.f32 %v732_v25, %v1839_v18  ;;  %v781_v22 = vperm.slane %v740_v51, 0  ;;  %v639_v19 = vmax.f32 %v631_v50, 0.0 }
  0xd5   : > { %v701_v24 = vmul.f32 %v1668_v11, %v1977_v41  ;;  %v607_v27 = vrot.slane %v606_v9, 1  ;;  %v741_v28 = vmul.f32 1.1111112, %v733_v49  ;;  %v861_v59 = vmul.f32 %v1928_v36, %v835_v10 }
  0xd6   : > { %v699_v29 = vsel %vm698_vm15, %v1666_v32, %v695_v16  ;;  %v862_v14 = vmul.f32 %v854_v8, %v836_v20  ;;  %v2005_v38 = vadd.f32 1e-05, %v639_v19  ;;  %v624_v18 = vmul.f32 %v1998_v17, %v1998_v17 }
  0xd7   : > { %v734_v31 = vmul.f32 %v699_v29, %v1887_v54  ;;  %v702_v33 = vmul.f32 %v1668_v11, %v701_v24  ;;  %v608_v39 = vadd.f32 %v607_v27, %v606_v9  ;;  %v750_v40 = vmul.f32 %v733_v49, %v1862_v44  ;;  %v844_v29 = vld [vmem:[%s1882_s30 + $0x8] sm:$0xff] }
  0xd8   : > { %v869_v25 = vpack.c.bf16 %v862_v14, %v861_v59  ;;  %v757_v43 = vsub.f32 %v1926_v35, %v749_v21  ;;  %1669 = vrsqrt.f32 %v2005_v38  ;;  %v782_v47 = vperm.slane %v741_v28, 0 }
  0xd9   : > { %v703_v45 = vmul.f32 0.5, %v702_v33  ;;  %v616_v32 = vmul.f32 0.125, %v608_v39  ;;  %v758_v36 = vsub.f32 %v1926_v35, %v750_v40  ;;  %vm707_vm0 = vweird.f32 %v1668_v11 }
  0xda   : > { %945 = vmatmul.bf16.vlgmr.msra.gmra.mxu1 %v869_v25  ;;  %v765_v46 = vmul.f32 1.1111112, %v757_v43  ;;  %v751_v48 = vmul.f32 %v734_v31, %v1905_v15  ;;  %v797_v52 = vmul.f32 %v781_v22, %v1803_v42  ;;  %vm706_vm1 = vweird.f32 %v1977_v41 }
  0xdb   : > { %v704_v51 = vsub.f32 1.5, %v703_v45  ;;  %v632_v53 = vsub.f32 %v616_v32, %v624_v18  ;;  %v766_v56 = vmul.f32 1.1111112, %v758_v36  ;;  %v847_v23 = vunpack.c.2.s8 %v1899_v4  ;;  %vm708_vm2 = vmor %vm706_vm1, %vm707_vm0 }
  0xdc   : > { %v813_v44 = vperm.slane %v765_v46, 0  ;;  %v848_v34 = vunpack.c.3.s8 %v1899_v4  ;;  %v798_v62 = vmul.f32 %v782_v47, %v1822_v0  ;;  %v759_v42 = vsub.f32 %v1926_v35, %v751_v48 }
  0xdd   : > { %v705_v13 = vmul.f32 %v1668_v11, %v704_v51  ;;  %v640_v57 = vmax.f32 %v632_v53, 0.0  ;;  %v814_v58 = vperm.slane %v766_v56, 0  ;;  %v742_v1 = vmul.f32 1.1111112, %v734_v31 }
  0xde   : > { %v829_v12 = vadd.f32 %v813_v44, %v797_v52  ;;  %v1670_v61 = vpop.eup %1669  ;;  %v855_v6 = vcvt.s32.f32 %v847_v23  ;;  %v856_v4 = vcvt.s32.f32 %v848_v34  ;;  %v767_v9 = vmul.f32 1.1111112, %v759_v42 }
  0xdf   : > { %v709_v15 = vsel %vm708_vm2, %v1668_v11, %v705_v13  ;;  %v711_v3 = vmul.f32 %v1670_v61, %v2005_v38  ;;  %v649_v41 = vadd.f32 1e-05, %v640_v57  ;;  %v830_v5 = vadd.f32 %v814_v58, %v798_v62 }
  0xe0   : > { %v735_v2 = vmul.f32 %v709_v15, %v1887_v54  ;;  %v837_v49 = vmax.f32 %v829_v12, 0.0  ;;  %v783_v10 = vperm.slane %v742_v1, 0  ;;  %vm717_vm3 = vweird.f32 %v1670_v61 }
  0xe1   : > { %v712_v8 = vmul.f32 %v1670_v61, %v711_v3  ;;  %1671 = vrsqrt.f32 %v649_v41  ;;  %v838_v50 = vmax.f32 %v830_v5, 0.0  ;;  %v815_v28 = vperm.slane %v767_v9, 0 }
  0xe2   : > { %v743_v55 = vmul.f32 1.1111112, %v735_v2  ;;  %v752_v0 = vmul.f32 %v735_v2, %v1945_v63  ;;  %v863_v20 = vmul.f32 %v855_v6, %v837_v49  ;;  %v799_v14 = vmul.f32 %v783_v10, %v1845_v26 }
  0xe3   : > { %v713_v11 = vmul.f32 0.5, %v712_v8  ;;  %v864_v21 = vmul.f32 %v856_v4, %v838_v50  ;;  %vm716_vm4 = vweird.f32 %v2005_v38  ;;  %v850_v18 = vunpack.c.1.s8 %v844_v29 }
  0xe4   : > { %v784_v16 = vperm.slane %v743_v55, 0  ;;  %v760_v22 = vsub.f32 %v1926_v35, %v752_v0  ;;  %vm718_vm5 = vmor %vm716_vm4, %vm717_vm3  ;;  %v849_v40 = vunpack.c.0.s8 %v844_v29  ;;  %v831_v32 = vadd.f32 %v815_v28, %v799_v14 }
  0xe5   : > { %v714_v24 = vsub.f32 1.5, %v713_v11  ;;  %v870_v19 = vpack.c.bf16 %v864_v21, %v863_v20  ;;  %v858_v26 = vcvt.s32.f32 %v850_v18  ;;  %vm726_vm7 = vweird.f32 %v649_v41 }
  0xe6   : > { %v768_v27 = vmul.f32 1.1111112, %v760_v22  ;;  %v800_v63 = vmul.f32 %v784_v16, %v1893_v60  ;;  %v857_v38 = vcvt.s32.f32 %v849_v40  ;;  %v839_v60 = vmax.f32 %v831_v32, 0.0 }
  0xe7   : > { %v1672_v59 = vpop.eup %1671  ;;  %v715_v31 = vmul.f32 %v1670_v61, %v714_v24  ;;  %950 = vmatmul.bf16.vlgmr.msra.gmra.mxu3 %v870_v19  ;;  %v852_v3 = vunpack.c.3.s8 %v844_v29  ;;  %v851_v5 = vunpack.c.2.s8 %v844_v29 }
  0xe8   : > { %v721_v33 = vmul.f32 %v1672_v59, %v649_v41  ;;  %v816_v39 = vperm.slane %v768_v27, 0  ;;  %vm727_vm6 = vweird.f32 %v1672_v59  ;;  %v865_v23 = vmul.f32 %v857_v38, %v839_v60  ;;  %v1629_v38 = vld [vmem:[%s2268_s3 + $0x28] sm:$0xff] }
  0xe9   : > { %v719_v25 = vsel %vm718_vm5, %v1670_v61, %v715_v31  ;;  %vm728_vm8 = vmor %vm726_vm7, %vm727_vm6  ;;  %v860_v4 = vcvt.s32.f32 %v852_v3  ;;  %v859_v8 = vcvt.s32.f32 %v851_v5 }
  0xea   : > { %v736_v43 = vmul.f32 %v719_v25, %v1887_v54  ;;  %v722_v45 = vmul.f32 %v1672_v59, %v721_v33  ;;  %v832_v36 = vadd.f32 %v816_v39, %v800_v63 }
  0xec   : > { %v723_v46 = vmul.f32 0.5, %v722_v45  ;;  %v840_v47 = vmax.f32 %v832_v36, 0.0  ;;  %v753_v51 = vmul.f32 %v736_v43, %v1974_v37  ;;  %v744_v53 = vmul.f32 1.1111112, %v736_v43  ;;  %v1630_v43 = vld [vmem:[%s2268_s3 + $0x30] sm:$0xff] }
  0xee   : > { %v724_v48 = vsub.f32 1.5, %v723_v46  ;;  %v761_v52 = vsub.f32 %v1926_v35, %v753_v51  ;;  %v866_v44 = vmul.f32 %v858_v26, %v840_v47  ;;  %v785_v58 = vperm.slane %v744_v53, 0 }
  0xf0   : > { %v725_v56 = vmul.f32 %v1672_v59, %v724_v48  ;;  %v769_v34 = vmul.f32 1.1111112, %v761_v52  ;;  %v871_v12 = vpack.c.bf16 %v866_v44, %v865_v23  ;;  %v801_v1 = vmul.f32 %v785_v58, %v1919_v30 }
  0xf2   : > { %v729_v13 = vsel %vm728_vm8, %v1672_v59, %v725_v56  ;;  %v817_v62 = vperm.slane %v769_v34, 0  ;;  %v1631_v59 = vld [vmem:[%s2268_s3 + $0x38] sm:$0xff] }
  0xf3   : > { %v737_v57 = vmul.f32 %v729_v13, %v1887_v54  ;;  %1410 = vmatpush.bf16.msrb.mxu1 %v1631_v59  ;;  %1640 = vmatpush.bf16.msra.mxu2 %v1631_v59 }
  0xf4   : > { %v833_v41 = vadd.f32 %v817_v62, %v801_v1  ;;  %v1627_v1 = vld [vmem:[%s2268_s3 + $0x18] sm:$0xff] }
  0xf5   : > { %v745_v61 = vmul.f32 1.1111112, %v737_v57  ;;  %v754_v37 = vmul.f32 %v737_v57, %v1998_v17  ;;  %v1628_v57 = vld [vmem:[%s2268_s3 + $0x20] sm:$0xff] }
  0xf6   : > { %v841_v55 = vmax.f32 %v833_v41, 0.0 }
  0xf7   : > { %v762_v15 = vsub.f32 %v1926_v35, %v754_v37  ;;  %v786_v42 = vperm.slane %v745_v61, 0  ;;  %955 = vmatmul.bf16.gmra.mxu3 %v871_v12  ;;  %1411 = vmatpush.bf16.msrb.mxu1 %v1630_v43 }
  0xf8   : > { %v867_v0 = vmul.f32 %v859_v8, %v841_v55  ;;  %1641 = vmatpush.bf16.msra.mxu2 %v1630_v43  ;;  %v1626_v8 = vld [vmem:[%s2268_s3 + $0x10] sm:$0xff] }
  0xf9   : > { %v770_v2 = vmul.f32 1.1111112, %v762_v15  ;;  %v802_v49 = vmul.f32 %v786_v42, %v1959_v7 }
  0xfb   : > { %v818_v6 = vperm.slane %v770_v2, 0  ;;  %1412 = vmatpush.bf16.msrb.mxu1 %v1629_v38 }
  0xfc   : > { %1642 = vmatpush.bf16.msra.mxu2 %v1629_v38 }
  0xfd   : > { %v834_v54 = vadd.f32 %v818_v6, %v802_v49 }
  0xff   : > { %v842_v50 = vmax.f32 %v834_v54, 0.0  ;;  %1413 = vmatpush.bf16.msrb.mxu1 %v1628_v57 }
 0x100   : > { %1643 = vmatpush.bf16.msra.mxu2 %v1628_v57 }
 0x101   : > { %v868_v17 = vmul.f32 %v860_v4, %v842_v50 }
 0x103   : > { %v872_v9 = vpack.c.bf16 %v868_v17, %v867_v0  ;;  %1414 = vmatpush.bf16.msrb.mxu1 %v1627_v1 }
 0x104   : > { %1644 = vmatpush.bf16.msra.mxu2 %v1627_v1 }
 0x107   : > { %960 = vmatmul.bf16.gmra.mxu3 %v872_v9  ;;  %1415 = vmatpush.bf16.msrb.mxu1 %v1626_v8 }
 0x108   : > { %1645 = vmatpush.bf16.msra.mxu2 %v1626_v8 }
 0x157   : > { %v2036_v35 = vpop.f32.mrf.mxu1 }
 0x158   : > { %v966_v30 = vrot.slane %v2036_v35, 4  ;;  %v1022_v10 = vmul.f32 %v2036_v35, %v2036_v35 }
 0x15a   : > { %v967_v11 = vadd.f32 %v966_v30, %v2036_v35  ;;  %v1030_v7 = vrot.slane %v1022_v10, 4 }
 0x15c   : > { %v968_v16 = vrot.slane %v967_v11, 2  ;;  %v1031_v20 = vadd.f32 %v1030_v7, %v1022_v10 }
 0x15e   : > { %v969_v21 = vadd.f32 %v968_v16, %v967_v11  ;;  %v1032_v22 = vrot.slane %v1031_v20, 2 }
 0x15f   : > { %v2042_v24 = vpop.f32.mrf.mxu1 }
 0x160   : > { %v970_v19 = vrot.slane %v969_v21, 1  ;;  %v1033_v27 = vadd.f32 %v1032_v22, %v1031_v20  ;;  %v972_v28 = vrot.slane %v2042_v24, 4  ;;  %v1023_v29 = vmul.f32 %v2042_v24, %v2042_v24 }
 0x162   : > { %v971_v14 = vadd.f32 %v970_v19, %v969_v21  ;;  %v1034_v31 = vrot.slane %v1033_v27, 1  ;;  %v973_v63 = vadd.f32 %v972_v28, %v2042_v24  ;;  %v1036_v33 = vrot.slane %v1023_v29, 4  ;;  %v1625_v21 = vld [vmem:[%s2268_s3 + $0x8] sm:$0xff] }
 0x163   : > { %1416 = vmatpush.bf16.msrb.mxu1 %v1625_v21  ;;  %1646 = vmatpush.bf16.msra.mxu2 %v1625_v21 }
 0x164   : > { %v2051_v39 = vmul.f32 0.125, %v971_v14  ;;  %v1035_v18 = vadd.f32 %v1034_v31, %v1033_v27  ;;  %v974_v25 = vrot.slane %v973_v63, 2  ;;  %v1037_v40 = vadd.f32 %v1036_v33, %v1023_v29  ;;  %v2110_v33 = vld [vmem:[%s2098_s16] sm:$0xff] }
 0x166   : > { %v1078_v45 = vmul.f32 0.125, %v1035_v18  ;;  %v1086_v32 = vmul.f32 %v2051_v39, %v2051_v39  ;;  %v975_v36 = vadd.f32 %v974_v25, %v973_v63  ;;  %v1038_v46 = vrot.slane %v1037_v40, 2  ;;  %v2115_v18 = vld [vmem:[%s2272_s7] sm:$0x1] }
 0x168   : > { %v1094_v47 = vsub.f32 %v1078_v45, %v1086_v32  ;;  %v976_v26 = vrot.slane %v975_v36, 1  ;;  %v1039_v51 = vadd.f32 %v1038_v46, %v1037_v40  ;;  %v1624_v45 = vld [vmem:[%s2268_s3] sm:$0xff] }
 0x169   : > { %1417 = vmatpush.bf16.msrb.mxu1 %v1624_v45  ;;  %1647 = vmatpush.bf16.msra.mxu2 %v1624_v45 }
 0x16a   : > { %v1102_v48 = vmax.f32 %v1094_v47, 0.0  ;;  %v977_v60 = vadd.f32 %v976_v26, %v975_v36  ;;  %v1040_v52 = vrot.slane %v1039_v51, 1  ;;  %v2065_v13 = vpop.f32.mrf.mxu3 }
 0x16b   : > { %v978_v23 = vrot.slane %v2065_v13, 4  ;;  %v1024_v34 = vmul.f32 %v2065_v13, %v2065_v13 }
 0x16c   : > { %v2061_v53 = vadd.f32 1e-05, %v1102_v48  ;;  %v2063_v56 = vmul.f32 0.125, %v977_v60  ;;  %v1041_v44 = vadd.f32 %v1040_v52, %v1039_v51  ;;  %v1314_v48 = vunpack.c.0.s8 %v2110_v33 }
 0x16d   : > { %v979_v61 = vadd.f32 %v978_v23, %v2065_v13  ;;  %v1042_v37 = vrot.slane %v1024_v34, 4  ;;  %v2132_v23 = vld [vmem:[%s2273_s8] sm:$0x1] }
 0x16e   : > { %1673 = vrsqrt.f32 %v2061_v53  ;;  %v1079_v58 = vmul.f32 0.125, %v1041_v44  ;;  %v1087_v12 = vmul.f32 %v2063_v56, %v2063_v56  ;;  %vm1125_vm10 = vweird.f32 %v2061_v53 }
 0x16f   : > { %v980_v15 = vrot.slane %v979_v61, 2  ;;  %v1043_v42 = vadd.f32 %v1042_v37, %v1024_v34 }
 0x170   : > { %v1095_v62 = vsub.f32 %v1079_v58, %v1087_v12 }
 0x171   : > { %v981_v3 = vadd.f32 %v980_v15, %v979_v61  ;;  %v1044_v41 = vrot.slane %v1043_v42, 2 }
 0x172   : > { %v1103_v2 = vmax.f32 %v1095_v62, 0.0  ;;  %v2082_v6 = vpop.f32.mrf.mxu3 }
 0x173   : > { %v982_v4 = vrot.slane %v981_v3, 1  ;;  %v1045_v55 = vadd.f32 %v1044_v41, %v1043_v42  ;;  %v984_v50 = vrot.slane %v2082_v6, 4  ;;  %v1025_v17 = vmul.f32 %v2082_v6, %v2082_v6 }
 0x174   : > { %v1674_v5 = vpop.eup %1673  ;;  %v2080_v49 = vadd.f32 1e-05, %v1103_v2 }
 0x175   : > { %v1120_v54 = vmul.f32 %v1674_v5, %v2061_v53  ;;  %v983_v9 = vadd.f32 %v982_v4, %v981_v3  ;;  %v1046_v30 = vrot.slane %v1045_v55, 1  ;;  %v985_v10 = vadd.f32 %v984_v50, %v2082_v6 }
 0x176   : > { %1675 = vrsqrt.f32 %v2080_v49  ;;  %v1048_v11 = vrot.slane %v1025_v17, 4  ;;  %vm1126_vm9 = vweird.f32 %v1674_v5  ;;  %vm1135_vm12 = vweird.f32 %v2080_v49 }
 0x177   : > { %v1121_v0 = vmul.f32 %v1674_v5, %v1120_v54  ;;  %v2100_v16 = vmul.f32 0.125, %v983_v9  ;;  %v1047_v20 = vadd.f32 %v1046_v30, %v1045_v55  ;;  %v986_v22 = vrot.slane %v985_v10, 2  ;;  %vm1127_vm11 = vmor %vm1125_vm10, %vm1126_vm9 }
 0x178   : > { %v1049_v19 = vadd.f32 %v1048_v11, %v1025_v17 }
 0x179   : > { %v1122_v7 = vmul.f32 0.5, %v1121_v0  ;;  %v1080_v28 = vmul.f32 0.125, %v1047_v20  ;;  %v1088_v29 = vmul.f32 %v2100_v16, %v2100_v16  ;;  %v987_v14 = vadd.f32 %v986_v22, %v985_v10 }
 0x17a   : > { %v1050_v31 = vrot.slane %v1049_v19, 2  ;;  %v2107_v63 = vpop.f32.mrf.mxu3  ;;  %v1322_v22 = vcvt.s32.f32 %v1314_v48 }
 0x17b   : > { %v1123_v27 = vsub.f32 1.5, %v1122_v7  ;;  %v1096_v43 = vsub.f32 %v1080_v28, %v1088_v29  ;;  %v988_v32 = vrot.slane %v987_v14, 1  ;;  %v990_v46 = vrot.slane %v2107_v63, 4 }
 0x17c   : > { %v1676_v59 = vpop.eup %1675  ;;  %v1051_v36 = vadd.f32 %v1050_v31, %v1049_v19  ;;  %v1026_v47 = vmul.f32 %v2107_v63, %v2107_v63 }
 0x17d   : > { %v1124_v25 = vmul.f32 %v1674_v5, %v1123_v27  ;;  %v1130_v40 = vmul.f32 %v1676_v59, %v2080_v49  ;;  %v1104_v38 = vmax.f32 %v1096_v43, 0.0  ;;  %v989_v52 = vadd.f32 %v988_v32, %v987_v14 }
 0x17e   : > { %v1052_v53 = vrot.slane %v1051_v36, 1  ;;  %v991_v44 = vadd.f32 %v990_v46, %v2107_v63  ;;  %v1054_v58 = vrot.slane %v1026_v47, 4  ;;  %vm1136_vm13 = vweird.f32 %v1676_v59 }
 0x17f   : > { %v1128_v26 = vsel %vm1127_vm11, %v1674_v5, %v1124_v25  ;;  %v1131_v51 = vmul.f32 %v1676_v59, %v1130_v40  ;;  %v2135_v57 = vadd.f32 1e-05, %v1104_v38  ;;  %v2138_v37 = vmul.f32 0.125, %v989_v52  ;;  %vm1137_vm14 = vmor %vm1135_vm12, %vm1136_vm13 }
 0x180   : > { %v1199_v60 = vmul.f32 %v1128_v26, %v2115_v18  ;;  %v1053_v62 = vadd.f32 %v1052_v53, %v1051_v36  ;;  %v992_v42 = vrot.slane %v991_v44, 2  ;;  %v1315_v5 = vunpack.c.1.s8 %v2110_v33 }
 0x181   : > { %v1132_v34 = vmul.f32 0.5, %v1131_v51  ;;  %1677 = vrsqrt.f32 %v2135_v57  ;;  %v1089_v3 = vmul.f32 %v2138_v37, %v2138_v37  ;;  %v1055_v4 = vadd.f32 %v1054_v58, %v1026_v47 }
 0x182   : > { %v1207_v12 = vmul.f32 1.1111112, %v1199_v60  ;;  %v1216_v61 = vmul.f32 %v1199_v60, %v2051_v39  ;;  %v1081_v2 = vmul.f32 0.125, %v1053_v62  ;;  %v2144_v41 = vpop.f32.mrf.mxu3  ;;  %v993_v39 = vadd.f32 %v992_v42, %v991_v44 }
 0x183   : > { %v1133_v15 = vsub.f32 1.5, %v1132_v34  ;;  %v996_v55 = vrot.slane %v2144_v41, 4  ;;  %v1027_v0 = vmul.f32 %v2144_v41, %v2144_v41  ;;  %v1056_v10 = vrot.slane %v1055_v4, 2 }
 0x184   : > { %v1224_v1 = vsub.f32 %v2132_v23, %v1216_v61  ;;  %v1248_v50 = vperm.slane %v1207_v12, 0  ;;  %v1097_v17 = vsub.f32 %v1081_v2, %v1089_v3  ;;  %v994_v30 = vrot.slane %v993_v39, 1 }
 0x185   : > { %v1134_v54 = vmul.f32 %v1676_v59, %v1133_v15  ;;  %v997_v11 = vadd.f32 %v996_v55, %v2144_v41  ;;  %v1057_v28 = vadd.f32 %v1056_v10, %v1055_v4  ;;  %v2154_v49 = vcvt.s32.f32 %v1315_v5 }
 0x186   : > { %v1232_v8 = vmul.f32 1.1111112, %v1224_v1  ;;  %v1105_v21 = vmax.f32 %v1097_v17, 0.0  ;;  %v995_v27 = vadd.f32 %v994_v30, %v993_v39  ;;  %v1264_v14 = vmul.f32 %v1248_v50, %v2036_v35 }
 0x187   : > { %v1138_v9 = vsel %vm1137_vm14, %v1676_v59, %v1134_v54  ;;  %v1678_v19 = vpop.eup %1677  ;;  %v998_v29 = vrot.slane %v997_v11, 2  ;;  %v1058_v45 = vrot.slane %v1057_v28, 1  ;;  %v1060_v32 = vrot.slane %v1027_v0, 4 }
 0x188   : > { %v1280_v7 = vperm.slane %v1232_v8, 0  ;;  %v1200_v20 = vmul.f32 %v1138_v9, %v2115_v18  ;;  %v1140_v25 = vmul.f32 %v1678_v19, %v2135_v57  ;;  %v2159_v40 = vadd.f32 1e-05, %v1105_v21 }
 0x189   : > { %v2161_v43 = vmul.f32 0.125, %v995_v27  ;;  %v999_v26 = vadd.f32 %v998_v29, %v997_v11  ;;  %vm1146_vm15 = vweird.f32 %v1678_v19  ;;  %v1059_v35 = vadd.f32 %v1058_v45, %v1057_v28 }
 0x18a   : > { %v1208_v31 = vmul.f32 1.1111112, %v1200_v20  ;;  %v1217_v59 = vmul.f32 %v1200_v20, %v2063_v56  ;;  %v1296_v36 = vadd.f32 %v1280_v7, %v1264_v14  ;;  %v1141_v47 = vmul.f32 %v1678_v19, %v1140_v25  ;;  %v2164_v51 = vpop.f32.mrf.mxu3 }
 0x18b   : > { %1679 = vrsqrt.f32 %v2159_v40  ;;  %v1090_v56 = vmul.f32 %v2161_v43, %v2161_v43  ;;  %v1000_v52 = vrot.slane %v999_v26, 1  ;;  %v1082_v53 = vmul.f32 0.125, %v1059_v35 }
 0x18c   : > { %v1225_v46 = vsub.f32 %v2132_v23, %v1217_v59  ;;  %v1249_v48 = vperm.slane %v1208_v31, 0  ;;  %v1142_v60 = vmul.f32 0.5, %v1141_v47  ;;  %v1061_v44 = vadd.f32 %v1060_v32, %v1027_v0 }
 0x18d   : > { %v1002_v34 = vrot.slane %v2164_v51, 4  ;;  %v1028_v58 = vmul.f32 %v2164_v51, %v2164_v51  ;;  %v1001_v62 = vadd.f32 %v1000_v52, %v999_v26  ;;  %v1304_v15 = vmax.f32 %v1296_v36, 0.0 }
 0x18e   : > { %v1233_v38 = vmul.f32 1.1111112, %v1225_v46  ;;  %v1143_v61 = vsub.f32 1.5, %v1142_v60  ;;  %v1098_v42 = vsub.f32 %v1082_v53, %v1090_v56  ;;  %v1062_v1 = vrot.slane %v1061_v44, 2 }
 0x18f   : > { %v1003_v2 = vadd.f32 %v1002_v34, %v2164_v51  ;;  %v1066_v3 = vrot.slane %v1028_v58, 4  ;;  %v1265_v5 = vmul.f32 %v1249_v48, %v2042_v24  ;;  %vm1145_vm0 = vweird.f32 %v2135_v57 }
 0x190   : > { %v1281_v12 = vperm.slane %v1233_v38, 0  ;;  %v1144_v54 = vmul.f32 %v1678_v19, %v1143_v61  ;;  %v2175_v39 = vmul.f32 0.125, %v1001_v62  ;;  %vm2178_vm1 = vmor %vm1145_vm0, %vm1146_vm15  ;;  %v1106_v8 = vmax.f32 %v1098_v42, 0.0 }
 0x191   : > { %v1680_v4 = vpop.eup %1679  ;;  %v1063_v50 = vadd.f32 %v1062_v1, %v1061_v44  ;;  %v1004_v17 = vrot.slane %v1003_v2, 2  ;;  %v1067_v0 = vadd.f32 %v1066_v3, %v1028_v58  ;;  %vm1155_vm2 = vweird.f32 %v2159_v40 }
 0x192   : > { %v1297_v9 = vadd.f32 %v1281_v12, %v1265_v5  ;;  %v1148_v30 = vsel %vm2178_vm1, %v1678_v19, %v1144_v54  ;;  %v1150_v24 = vmul.f32 %v1680_v4, %v2159_v40  ;;  %v2186_v57 = vpop.f32.mrf.mxu3  ;;  %v2188_v10 = vadd.f32 1e-05, %v1106_v8 }
 0x193   : > { %v1064_v11 = vrot.slane %v1063_v50, 1  ;;  %v1005_v7 = vadd.f32 %v1004_v17, %v1003_v2  ;;  %v1330_v20 = vmul.f32 %v1322_v22, %v1304_v15  ;;  %v1068_v27 = vrot.slane %v1067_v0, 2 }
 0x194   : > { %v1151_v21 = vmul.f32 %v1680_v4, %v1150_v24  ;;  %v1008_v28 = vrot.slane %v2186_v57, 4  ;;  %v1029_v29 = vmul.f32 %v2186_v57, %v2186_v57  ;;  %v1201_v19 = vmul.f32 %v1148_v30, %v2115_v18 }
 0x195   : > { %1681 = vrsqrt.f32 %v2188_v10  ;;  %v1065_v14 = vadd.f32 %v1064_v11, %v1063_v50  ;;  %v1091_v31 = vmul.f32 %v2175_v39, %v2175_v39  ;;  %v1006_v25 = vrot.slane %v1005_v7, 1 }
 0x196   : > { %v1152_v59 = vmul.f32 0.5, %v1151_v21  ;;  %v1069_v45 = vadd.f32 %v1068_v27, %v1067_v0  ;;  %v1009_v22 = vadd.f32 %v1008_v28, %v2186_v57  ;;  %vm1156_vm3 = vweird.f32 %v1680_v4 }
 0x197   : > { %v1083_v32 = vmul.f32 0.125, %v1065_v14  ;;  %v1072_v36 = vrot.slane %v1029_v29, 4  ;;  %v1305_v46 = vmax.f32 %v1297_v9, 0.0  ;;  %v1007_v26 = vadd.f32 %v1006_v25, %v1005_v7  ;;  %vm1157_vm4 = vmor %vm1155_vm2, %vm1156_vm3 }
 0x198   : > { %v1153_v47 = vsub.f32 1.5, %v1152_v59  ;;  %v1070_v35 = vrot.slane %v1069_v45, 1  ;;  %v1010_v56 = vrot.slane %v1009_v22, 2  ;;  %v1209_v38 = vmul.f32 1.1111112, %v1201_v19 }
 0x199   : > { %v1099_v48 = vsub.f32 %v1083_v32, %v1091_v31  ;;  %v1073_v60 = vadd.f32 %v1072_v36, %v1029_v29  ;;  %v1331_v52 = vmul.f32 %v2154_v49, %v1305_v46  ;;  %v2199_v44 = vmul.f32 0.125, %v1007_v26 }
 0x19a   : > { %v1154_v53 = vmul.f32 %v1680_v4, %v1153_v47  ;;  %v1071_v34 = vadd.f32 %v1070_v35, %v1069_v45  ;;  %v1011_v58 = vadd.f32 %v1010_v56, %v1009_v22  ;;  %v1218_v42 = vmul.f32 %v1201_v19, %v2100_v16 }
 0x19b   : > { %v1682_v12 = vpop.eup %1681  ;;  %v1107_v61 = vmax.f32 %v1099_v48, 0.0  ;;  %v1074_v62 = vrot.slane %v1073_v60, 2  ;;  %v1338_v15 = vpack.c.bf16 %v1331_v52, %v1330_v20  ;;  %v1092_v54 = vmul.f32 %v2199_v44, %v2199_v44 }
 0x19c   : > { %v1158_v1 = vsel %vm1157_vm4, %v1680_v4, %v1154_v53  ;;  %v1160_v2 = vmul.f32 %v1682_v12, %v2188_v10  ;;  %v1084_v3 = vmul.f32 0.125, %v1071_v34  ;;  %v1012_v55 = vrot.slane %v1011_v58, 1 }
 0x19d   : > { %v1202_v49 = vmul.f32 %v1158_v1, %v2115_v18  ;;  %v2207_v5 = vadd.f32 1e-05, %v1107_v61  ;;  %1418 = vmatmul.bf16.vlgmr.msrb.gmra.mxu1 %v1338_v15  ;;  %v1075_v8 = vadd.f32 %v1074_v62, %v1073_v60  ;;  %v1226_v50 = vsub.f32 %v2132_v23, %v1218_v42 }
 0x19e   : > { %v1161_v40 = vmul.f32 %v1682_v12, %v1160_v2  ;;  %v1316_v17 = vunpack.c.2.s8 %v2110_v33  ;;  %v1250_v16 = vperm.slane %v1209_v38, 0  ;;  %v1100_v0 = vsub.f32 %v1084_v3, %v1092_v54 }
 0x19f   : > { %v1210_v4 = vmul.f32 1.1111112, %v1202_v49  ;;  %1683 = vrsqrt.f32 %v2207_v5  ;;  %v1013_v30 = vadd.f32 %v1012_v55, %v1011_v58  ;;  %v1076_v24 = vrot.slane %v1075_v8, 1 }
 0x1a0   : > { %v1162_v9 = vmul.f32 0.5, %v1161_v40  ;;  %v1219_v11 = vmul.f32 %v1202_v49, %v2138_v37  ;;  %vm1165_vm5 = vweird.f32 %v2188_v10  ;;  %vm1166_vm6 = vweird.f32 %v1682_v12 }
 0x1a1   : > { %v1108_v7 = vmax.f32 %v1100_v0, 0.0  ;;  %v1234_v20 = vmul.f32 1.1111112, %v1226_v50  ;;  %v2216_v27 = vmul.f32 0.125, %v1013_v30  ;;  %v1077_v28 = vadd.f32 %v1076_v24, %v1075_v8  ;;  %vm1167_vm7 = vmor %vm1165_vm5, %vm1166_vm6 }
 0x1a2   : > { %v1163_v21 = vsub.f32 1.5, %v1162_v9  ;;  %v1227_v29 = vsub.f32 %v2132_v23, %v1219_v11  ;;  %v1266_v19 = vmul.f32 %v1250_v16, %v2065_v13  ;;  %v1251_v14 = vperm.slane %v1210_v4, 0 }
 0x1a3   : > { %v1117_v31 = vadd.f32 1e-05, %v1108_v7  ;;  %v1282_v59 = vperm.slane %v1234_v20, 0  ;;  %v1085_v45 = vmul.f32 0.125, %v1077_v28  ;;  %v1093_v37 = vmul.f32 %v2216_v27, %v2216_v27 }
 0x1a4   : > { %v1164_v25 = vmul.f32 %v1682_v12, %v1163_v21  ;;  %v1235_v22 = vmul.f32 1.1111112, %v1227_v29  ;;  %v1317_v46 = vunpack.c.3.s8 %v2110_v33  ;;  %v1267_v35 = vmul.f32 %v1251_v14, %v2082_v6 }
 0x1a5   : > { %v1684_v32 = vpop.eup %1683  ;;  %1685 = vrsqrt.f32 %v1117_v31  ;;  %v1298_v36 = vadd.f32 %v1282_v59, %v1266_v19  ;;  %v1101_v26 = vsub.f32 %v1085_v45, %v1093_v37  ;;  %v1324_v52 = vcvt.s32.f32 %v1316_v17 }
 0x1a6   : > { %v1168_v47 = vsel %vm1167_vm7, %v1682_v12, %v1164_v25  ;;  %v1170_v13 = vmul.f32 %v1684_v32, %v2207_v5  ;;  %v1283_v38 = vperm.slane %v1235_v22, 0  ;;  %v1325_v10 = vcvt.s32.f32 %v1317_v46 }
 0x1a7   : > { %v1203_v56 = vmul.f32 %v1168_v47, %v2115_v18  ;;  %v1109_v60 = vmax.f32 %v1101_v26, 0.0  ;;  %v1306_v34 = vmax.f32 %v1298_v36, 0.0  ;;  %vm1176_vm8 = vweird.f32 %v1684_v32 }
 0x1a8   : > { %v1171_v48 = vmul.f32 %v1684_v32, %v1170_v13  ;;  %v1299_v53 = vadd.f32 %v1283_v38, %v1267_v35  ;;  %vm1175_vm9 = vweird.f32 %v2207_v5  ;;  %v1313_v5 = vld [vmem:[%s2098_s16 + $0x8] sm:$0xff]  ;;  %vm1185_vm12 = vweird.f32 %v1117_v31 }
 0x1a9   : > { %v1220_v58 = vmul.f32 %v1203_v56, %v2161_v43  ;;  %v1118_v62 = vadd.f32 1e-05, %v1109_v60  ;;  %v1211_v42 = vmul.f32 1.1111112, %v1203_v56  ;;  %v1332_v2 = vmul.f32 %v1324_v52, %v1306_v34  ;;  %vm1177_vm10 = vmor %vm1175_vm9, %vm1176_vm8 }
 0x1aa   : > { %v1172_v61 = vmul.f32 0.5, %v1171_v48  ;;  %v1307_v12 = vmax.f32 %v1299_v53, 0.0  ;;  %v1318_v14 = vunpack.c.0.s8 %v1313_v5  ;;  %v1319_v59 = vunpack.c.1.s8 %v1313_v5 }
 0x1ab   : > { %v1686_v33 = vpop.eup %1685  ;;  %v1228_v15 = vsub.f32 %v2132_v23, %v1220_v58  ;;  %1687 = vrsqrt.f32 %v1118_v62  ;;  %v1252_v40 = vperm.slane %v1211_v42, 0  ;;  %vm1195_vm15 = vweird.f32 %v1118_v62 }
 0x1ac   : > { %v1173_v6 = vsub.f32 1.5, %v1172_v61  ;;  %v1180_v1 = vmul.f32 %v1686_v33, %v1117_v31  ;;  %v1333_v3 = vmul.f32 %v1325_v10, %v1307_v12  ;;  %vm1186_vm11 = vweird.f32 %v1686_v33 }
 0x1ad   : > { %v1236_v55 = vmul.f32 1.1111112, %v1228_v15  ;;  %v1268_v11 = vmul.f32 %v1252_v40, %v2107_v63  ;;  %vm1187_vm13 = vmor %vm1185_vm12, %vm1186_vm11  ;;  %v1326_v36 = vcvt.s32.f32 %v1318_v14  ;;  %v1327_v46 = vcvt.s32.f32 %v1319_v59 }
 0x1ae   : > { %v1174_v49 = vmul.f32 %v1684_v32, %v1173_v6  ;;  %v1181_v54 = vmul.f32 %v1686_v33, %v1180_v1  ;;  %v1339_v43 = vpack.c.bf16 %v1333_v3, %v1332_v2  ;;  %v1321_v15 = vunpack.c.3.s8 %v1313_v5 }
 0x1af   : > { %v1284_v0 = vperm.slane %v1236_v55, 0  ;;  %v1320_v6 = vunpack.c.2.s8 %v1313_v5  ;;  %vm1439_vm1 = vcmask 64512  }
 0x1b0   : > { %v1178_v8 = vsel %vm1177_vm10, %v1684_v32, %v1174_v49  ;;  %v1182_v50 = vmul.f32 0.5, %v1181_v54  ;;  %1423 = vmatmul.bf16.vlgmr.msra.gmra.mxu2 %v1339_v43  ;;  %v1329_v3 = vcvt.s32.f32 %v1321_v15 }
 0x1b1   : > { %v1204_v17 = vmul.f32 %v1178_v8, %v2115_v18  ;;  %v1688_v16 = vpop.eup %1687  ;;  %v1300_v19 = vadd.f32 %v1284_v0, %v1268_v11 }
 0x1b2   : > { %v1183_v4 = vsub.f32 1.5, %v1182_v50  ;;  %v1190_v30 = vmul.f32 %v1688_v16, %v1118_v62  ;;  %vm1196_vm14 = vweird.f32 %v1688_v16 }
 0x1b3   : > { %v1212_v9 = vmul.f32 1.1111112, %v1204_v17  ;;  %v1221_v24 = vmul.f32 %v1204_v17, %v2175_v39  ;;  %v1308_v32 = vmax.f32 %v1300_v19, 0.0  ;;  %vm1197_vm0 = vmor %vm1195_vm15, %vm1196_vm14 }
 0x1b4   : > { %v1184_v7 = vmul.f32 %v1686_v33, %v1183_v4  ;;  %v1191_v21 = vmul.f32 %v1688_v16, %v1190_v30 }
 0x1b5   : > { %v1253_v20 = vperm.slane %v1212_v9, 0  ;;  %v1229_v28 = vsub.f32 %v2132_v23, %v1221_v24  ;;  %v1334_v52 = vmul.f32 %v1326_v36, %v1308_v32 }
 0x1b6   : > { %v1188_v29 = vsel %vm1187_vm13, %v1686_v33, %v1184_v7  ;;  %v1192_v45 = vmul.f32 0.5, %v1191_v21 }
 0x1b7   : > { %v1205_v25 = vmul.f32 %v1188_v29, %v2115_v18  ;;  %v1237_v37 = vmul.f32 1.1111112, %v1229_v28  ;;  %v1269_v39 = vmul.f32 %v1253_v20, %v2144_v41 }
 0x1b8   : > { %v1193_v22 = vsub.f32 1.5, %v1192_v45 }
 0x1b9   : > { %v1285_v63 = vperm.slane %v1237_v37, 0  ;;  %v1222_v31 = vmul.f32 %v1205_v25, %v2199_v44  ;;  %v1213_v47 = vmul.f32 1.1111112, %v1205_v25 }
 0x1ba   : > { %v1194_v13 = vmul.f32 %v1688_v16, %v1193_v22 }
 0x1bb   : > { %v1301_v26 = vadd.f32 %v1285_v63, %v1269_v39  ;;  %v1230_v35 = vsub.f32 %v2132_v23, %v1222_v31  ;;  %v1254_v41 = vperm.slane %v1213_v47, 0 }
 0x1bc   : > { %v1198_v56 = vsel %vm1197_vm0, %v1688_v16, %v1194_v13 }
 0x1bd   : > { %v1309_v38 = vmax.f32 %v1301_v26, 0.0  ;;  %v1238_v48 = vmul.f32 1.1111112, %v1230_v35  ;;  %v1206_v60 = vmul.f32 %v1198_v56, %v2115_v18  ;;  %v1270_v33 = vmul.f32 %v1254_v41, %v2164_v51  ;;  %v1656_v51 = vld [vmem:[%s2269_s4] ss:$0 sm:$0xff] }
 0x1bf   : > { %v1335_v53 = vmul.f32 %v1327_v46, %v1309_v38  ;;  %v1214_v34 = vmul.f32 1.1111112, %v1206_v60  ;;  %v1223_v44 = vmul.f32 %v1206_v60, %v2216_v27  ;;  %v1286_v58 = vperm.slane %v1238_v48, 0 }
 0x1c0   : > { %v1328_v27 = vcvt.s32.f32 %v1320_v6 }
 0x1c1   : > { %v1340_v10 = vpack.c.bf16 %v1335_v53, %v1334_v52  ;;  %v1231_v61 = vsub.f32 %v2132_v23, %v1223_v44  ;;  %v1255_v62 = vperm.slane %v1214_v34, 0  ;;  %v1302_v42 = vadd.f32 %v1286_v58, %v1270_v33 }
 0x1c3   : > { %1428 = vmatmul.bf16.gmra.mxu2 %v1340_v10  ;;  %v1239_v12 = vmul.f32 1.1111112, %v1231_v61  ;;  %v1271_v18 = vmul.f32 %v1255_v62, %v2186_v57  ;;  %v1310_v49 = vmax.f32 %v1302_v42, 0.0 }
 0x1c5   : > { %v1287_v1 = vperm.slane %v1239_v12, 0  ;;  %v1336_v43 = vmul.f32 %v1328_v27, %v1310_v49 }
 0x1c7   : > { %v1303_v2 = vadd.f32 %v1287_v1, %v1271_v18 }
 0x1c9   : > { %v1311_v54 = vmax.f32 %v1303_v2, 0.0 }
 0x1cb   : > { %v1337_v55 = vmul.f32 %v1329_v3, %v1311_v54 }
 0x1cd   : > { %v1341_v23 = vpack.c.bf16 %v1337_v55, %v1336_v43 }
 0x1d3   : > { %1433 = vmatmul.bf16.gmra.mxu2 %v1341_v23 }
 0x21a   : > { %v1419_v57 = vpop.f32.mrf.mxu1 }
 0x21b   : > { %v1420_v40 = vadd.f32 %v1656_v51, %v1419_v57 }
 0x21d   : > { %1440 = vst.msk [vmem:[%s432_s13] sm:$0xff] %vm1439_vm1, %v1420_v40 }
 0x222   : > { %v1421_v8 = vpop.f32.mrf.mxu1 }
 0x223   : > { %v1422_v50 = vadd.f32 %v1656_v51, %v1421_v8 }
 0x225   : > { %1441 = vst.msk [vmem:[%s432_s13 + $0x8] sm:$0xff] %vm1439_vm1, %v1422_v50 }
 0x233   : > { %v1424_v17 = vpop.f32.mrf.mxu2 }
 0x234   : > { %v1425_v16 = vadd.f32 %v1656_v51, %v1424_v17 }
 0x236   : > { %1442 = vst.msk [vmem:[%s432_s13 + $0x10] sm:$0xff] %vm1439_vm1, %v1425_v16 }
 0x23b   : > { %v1426_v4 = vpop.f32.mrf.mxu2 }
 0x23c   : > { %v1427_v0 = vadd.f32 %v1656_v51, %v1426_v4 }
 0x23e   : > { %1443 = vst.msk [vmem:[%s432_s13 + $0x18] sm:$0xff] %vm1439_vm1, %v1427_v0 }
 0x246   : > { %v1429_v9 = vpop.f32.mrf.mxu2 }
 0x247   : > { %v1430_v30 = vadd.f32 %v1656_v51, %v1429_v9 }
 0x249   : > { %1444 = vst.msk [vmem:[%s432_s13 + $0x20] sm:$0xff] %vm1439_vm1, %v1430_v30 }
 0x24e   : > { %v1431_v24 = vpop.f32.mrf.mxu2 }
 0x24f   : > { %v1432_v5 = vadd.f32 %v1656_v51, %v1431_v24 }
 0x251   : > { %1445 = vst.msk [vmem:[%s432_s13 + $0x28] sm:$0xff] %vm1439_vm1, %v1432_v5 }
 0x256   : > { %v1434_v11 = vpop.f32.mrf.mxu2 }
 0x257   : > { %v1435_v7 = vadd.f32 %v1656_v51, %v1434_v11 }
 0x259   : > { %1446 = vst.msk [vmem:[%s432_s13 + $0x30] sm:$0xff] %vm1439_vm1, %v1435_v7 }
 0x25e   : > { %v1436_v20 = vpop.f32.mrf.mxu2 }
 0x25f   : > { %v1437_v21 = vadd.f32 %v1656_v51, %v1436_v20 }
 0x261   : > { %1447 = vst.msk [vmem:[%s432_s13 + $0x38] sm:$0xff] %vm1439_vm1, %v1437_v21 }
 0x262 PF: > { %s21_s17 = sadd.s32 1, %s1695_s17  }
 0x263   : > { %p18_p5 = scmp.ge.s32.totalorder %s21_s17, 4  }
 0x265   :  { %20 = sbr.rel (!%p18_p5) target bundleno = 1 (0x1), region = 100 }

</bundles_post_ra>
